<compile_context>
chip_gen: v6e
topology: v6e:2x2x1
jax: 0.10.0
libtpu: 0.0.40
codegen_flags: <defaults>
</compile_context>

<pallas_src>
import math

import jax
import jax.numpy as jnp
from jax.experimental import pallas as pl
from jax.experimental.pallas import tpu as pltpu

# ---- model hyper-parameters (small, consistent with the module) -------------
D_MODEL = 32
D_HEAD = 8
N_HEADS = D_MODEL // D_HEAD
D_FF = 4                       # torch default d_ff=4 -> hidden = 4 * d_model
D_HIDDEN = D_FF * D_MODEL
N_LAYERS = 2
VOCAB = 512
SEQ = 8
LN_EPS = 1e-5

# lane offsets inside the per-layer bf16 weight slab wa[l] : (32, 256)
_QKV_LO, _QKV_HI = 0, 3 * D_MODEL                    # (32, 96)  fused q|k|v
_OUT_LO, _OUT_HI = 3 * D_MODEL, 4 * D_MODEL          # (32, 32)  attn out proj
_UP_LO, _UP_HI = 4 * D_MODEL, 4 * D_MODEL + D_HIDDEN # (32, 128) mlp up
_WA_W = _UP_HI                                        # 256


# ---- small in-kernel helpers -------------------------------------------------
def _erf(x):
    # Abramowitz & Stegun 7.1.26 (|err| < 1.5e-7): exact-GELU erf using only
    # exp/mul/add so it is guaranteed to lower in Mosaic.
    a1, a2, a3, a4, a5 = 0.254829592, -0.284496736, 1.421413741, -1.453152027, 1.061405429
    p = 0.3275911
    s = jnp.where(x >= 0.0, 1.0, -1.0)
    ax = jnp.abs(x)
    t = 1.0 / (1.0 + p * ax)
    poly = ((((a5 * t + a4) * t + a3) * t + a2) * t + a1) * t
    return s * (1.0 - poly * jnp.exp(-ax * ax))


def _gelu_exact(x):
    # torch.nn.GELU() default (erf-based, not tanh approximation)
    return 0.5 * x * (1.0 + _erf(x * (1.0 / math.sqrt(2.0))))


# ---- fused Pallas kernel (whole forward) -------------------------------------
def fused_forward_kernel(ids_ref, emb_ref, smalls_ref, wa_ref, wdown_ref,
                         wembT_ref, o_ref):
    bf16 = jnp.bfloat16
    f32 = jnp.float32

    # --- in-kernel embedding gather: ids in SMEM, f32 table resident in VMEM --
    rows = [emb_ref[ids_ref[s]] for s in range(SEQ)]        # each (1, D) f32
    x = jnp.concatenate(rows, axis=0)                       # (S, D) f32

    for l in range(N_LAYERS):                               # static, unrolled
        sm = smalls_ref[l]                                  # (2, 96) f32
        ln_w = sm[0:1, 0:D_MODEL]                           # (1, D)
        ln_b = sm[0:1, D_MODEL:2 * D_MODEL]
        b_out = sm[0:1, 2 * D_MODEL:3 * D_MODEL]
        bqkv = sm[1:2, :]                                   # (1, 96), q-scale folded

        # --- LayerNorm 1 (f32, VPU) ---
        mu = jnp.mean(x, axis=-1, keepdims=True)
        var = jnp.mean((x - mu) ** 2, axis=-1, keepdims=True)
        h = (x - mu) * jax.lax.rsqrt(var + LN_EPS)
        h = (h * ln_w + ln_b).astype(bf16)                  # bf16 MXU input

        # --- fused q/k/v projection: one lane-dense (8,32)x(32,96) push ---
        qkv = jnp.dot(h, wa_ref[l, :, _QKV_LO:_QKV_HI],
                      preferred_element_type=f32) + bqkv    # (S, 96) f32

        # --- per-head attention (bf16 MXU operands, f32 softmax) ---
        head_outs = []
        for hd in range(N_HEADS):
            q = qkv[:, hd * D_HEAD:(hd + 1) * D_HEAD].astype(bf16)
            k = qkv[:, D_MODEL + hd * D_HEAD:
                    D_MODEL + (hd + 1) * D_HEAD].astype(bf16)
            v = qkv[:, 2 * D_MODEL + hd * D_HEAD:
                    2 * D_MODEL + (hd + 1) * D_HEAD].astype(bf16)
            s = jax.lax.dot_general(q, k, (((1,), (1,)), ((), ())),
                                    preferred_element_type=f32)   # (S, S)
            m = jnp.max(s, axis=-1, keepdims=True)
            e = jnp.exp(s - m)
            inv = pl.reciprocal(jnp.sum(e, axis=-1, keepdims=True), approx=True)
            p = e * inv
            head_outs.append(jnp.dot(p.astype(bf16), v,
                                     preferred_element_type=f32))  # (S, Dh)
        o_cat = jnp.concatenate(head_outs, axis=-1).astype(bf16)   # (S, D)

        # --- dense output projection: one (8,32)x(32,32) push ---
        attn = jnp.dot(o_cat, wa_ref[l, :, _OUT_LO:_OUT_HI],
                       preferred_element_type=f32) + b_out         # (S, D)
        x = x + attn                                               # residual 1

        # --- MLP (reference forward never applies ln2) ---
        up = jnp.dot(x.astype(bf16), wa_ref[l, :, _UP_LO:_UP_HI],
                     preferred_element_type=f32)                   # (S, 4D)
        act = _gelu_exact(up)
        down = jnp.dot(act.astype(bf16), wdown_ref[l],
                       preferred_element_type=f32)                 # (S, D)
        x = x + down                                               # residual 2

    # --- tied-embedding logits (this vocab chunk) + softmax over SEQ axis ---
    logits = jnp.dot(x.astype(bf16), wembT_ref[...],
                     preferred_element_type=f32)                   # (S, Vchunk)
    m = jnp.max(logits, axis=0, keepdims=True)
    e = jnp.exp(logits - m)
    inv = pl.reciprocal(jnp.sum(e, axis=0, keepdims=True), approx=True)
    o_ref[...] = e * inv


# ---- wrappers ---------------------------------------------------------------
def _default_vocab_chunks():
    # v7x has 2 TensorCores per chip: split the dominant logits/softmax vocab
    # axis across them (parallel grid). Single-TC chips (v5e/v6e) keep
    # grid=(1,) so the tiny transformer layers are not recomputed serially.
    try:
        kind = jax.devices()[0].device_kind.lower().replace(" ", "")
    except Exception:
        return 1
    return 2 if ("v7" in kind or "tpu7" in kind) else 1


def _cost_estimate(packed):
    flops_layer = (2 * SEQ * D_MODEL * (3 * D_MODEL)          # fused qkv proj
                   + 2 * 2 * N_HEADS * SEQ * SEQ * D_HEAD     # scores + p@v
                   + 2 * SEQ * D_MODEL * D_MODEL              # out projection
                   + 2 * 2 * SEQ * D_MODEL * D_HIDDEN)        # mlp up + down
    flops = N_LAYERS * flops_layer + 2 * SEQ * D_MODEL * VOCAB
    trans = N_LAYERS * (N_HEADS * SEQ * SEQ + SEQ * D_HIDDEN) + SEQ * VOCAB
    nbytes = SEQ * 4 + SEQ * VOCAB * 4
    for k in ("emb_gather", "smalls", "wa", "wdown", "wemb_t"):
        a = packed[k]
        nbytes += math.prod(a.shape) * a.dtype.itemsize
    return pl.CostEstimate(flops=int(flops), transcendentals=int(trans),
                           bytes_accessed=int(nbytes))


def transformer_forward(input_ids, packed, *, vocab_chunks=None):
    if vocab_chunks is None:
        vocab_chunks = _default_vocab_chunks()
    if VOCAB % (vocab_chunks * 128) != 0:
        vocab_chunks = 1
    vchunk = VOCAB // vocab_chunks

    grid_spec = pltpu.PrefetchScalarGridSpec(
        num_scalar_prefetch=1,                               # input_ids -> SMEM
        grid=(vocab_chunks,),
        in_specs=[
            pl.BlockSpec((VOCAB, 1, D_MODEL), lambda i, ids: (0, 0, 0)),        # emb gather tbl
            pl.BlockSpec((N_LAYERS, 2, 3 * D_MODEL), lambda i, ids: (0, 0, 0)), # small f32 params
            pl.BlockSpec((N_LAYERS, D_MODEL, _WA_W), lambda i, ids: (0, 0, 0)), # bf16 weight slab
            pl.BlockSpec((N_LAYERS, D_HIDDEN, D_MODEL), lambda i, ids: (0, 0, 0)),  # mlp down
            pl.BlockSpec((D_MODEL, vchunk), lambda i, ids: (0, i)),             # embed^T chunk
        ],
        out_specs=pl.BlockSpec((SEQ, vchunk), lambda i, ids: (0, i)),
    )

    probs = pl.pallas_call(
        fused_forward_kernel,
        out_shape=jax.ShapeDtypeStruct((SEQ, VOCAB), jnp.float32),
        grid_spec=grid_spec,
        compiler_params=pltpu.CompilerParams(
            dimension_semantics=("parallel",)),
        cost_estimate=_cost_estimate(packed),
    )(input_ids.astype(jnp.int32), packed["emb_gather"], packed["smalls"],
      packed["wa"], packed["wdown"], packed["wemb_t"])
    return probs[None]                                       # (1, S, V), like unsqueeze(0)


# ---- deterministic parameter construction (PyTorch [out, in] convention) -----
def build_params(key):
    def nrm(k, shape, scale=0.02):
        return scale * jax.random.normal(k, shape, jnp.float32)

    keys = jax.random.split(key, 1 + N_LAYERS)
    params = {"w_embed": nrm(keys[0], (VOCAB, D_MODEL)), "layers": []}
    for li in range(N_LAYERS):
        ks = jax.random.split(keys[1 + li], 8)
        params["layers"].append({
            "ln1_w": jnp.ones((1, D_MODEL), jnp.float32),
            "ln1_b": jnp.zeros((1, D_MODEL), jnp.float32),
            "wqkv": nrm(ks[0], (3 * D_MODEL, D_MODEL)),
            "bqkv": nrm(ks[1], (1, 3 * D_MODEL)),
            "wout": nrm(ks[2], (D_MODEL, D_MODEL)),
            "bout": nrm(ks[3], (1, D_MODEL)),
            "wup": nrm(ks[4], (D_HIDDEN, D_MODEL)),
            "wdown": nrm(ks[5], (D_MODEL, D_HIDDEN)),
        })
    return params


def pack_params(params):
    """Host-side re-layout into lane-dense slabs:
       - (L, 32, 256) bf16 slab [wqkv(96) | wout(32) | wup(128)], pre-transposed
         to [in, out], with 1/sqrt(d_head) folded into the q columns;
       - (L, 128, 32) bf16 mlp-down weights;
       - (L, 2, 96) f32 small params: row0 = [ln1_w | ln1_b | b_out], row1 = bqkv;
       - f32 (V, 1, D) gather table and bf16 (D, V) tied-embedding matrix."""
    scale = 1.0 / math.sqrt(D_HEAD)
    bf = jnp.bfloat16
    smalls, wa, wdown = [], [], []
    for lp in params["layers"]:
        bqkv = lp["bqkv"].reshape(3 * D_MODEL)
        bqkv = jnp.concatenate([bqkv[:D_MODEL] * scale, bqkv[D_MODEL:]])
        smalls.append(jnp.stack([
            jnp.concatenate([lp["ln1_w"].reshape(D_MODEL),
                             lp["ln1_b"].reshape(D_MODEL),
                             lp["bout"].reshape(D_MODEL)]),
            bqkv], axis=0))                                           # (2, 96)
        wqkv_t = lp["wqkv"].T                                         # (32, 96) cols [q|k|v]
        wqkv_t = jnp.concatenate([wqkv_t[:, :D_MODEL] * scale,
                                  wqkv_t[:, D_MODEL:]], axis=1)
        wa.append(jnp.concatenate([wqkv_t, lp["wout"].T, lp["wup"].T],
                                  axis=1))                            # (32, 256)
        wdown.append(lp["wdown"].T)                                   # (128, 32)
    return {
        "emb_gather": params["w_embed"].astype(jnp.float32).reshape(VOCAB, 1, D_MODEL),
        "smalls": jnp.stack(smalls).astype(jnp.float32),              # (L, 2, 96)
        "wa": jnp.stack(wa).astype(bf),                               # (L, 32, 256)
        "wdown": jnp.stack(wdown).astype(bf),                         # (L, 128, 32)
        "wemb_t": params["w_embed"].T.astype(bf),                     # (32, 512)
    }


# ---- pure-JAX f32 reference (mirrors the torch forward) ----------------------
def reference_forward(input_ids, params):
    x = params["w_embed"][input_ids].astype(jnp.float32)
    scale = 1.0 / math.sqrt(D_HEAD)
    for lp in params["layers"]:
        mu = x.mean(-1, keepdims=True)
        var = ((x - mu) ** 2).mean(-1, keepdims=True)
        h = (x - mu) / jnp.sqrt(var + LN_EPS)
        h = h * lp["ln1_w"].reshape(-1) + lp["ln1_b"].reshape(-1)
        qkv = h @ lp["wqkv"].T + lp["bqkv"].reshape(-1)
        outs = []
        for hd in range(N_HEADS):
            q = qkv[:, hd * D_HEAD:(hd + 1) * D_HEAD]
            k = qkv[:, D_MODEL + hd * D_HEAD:D_MODEL + (hd + 1) * D_HEAD]
            v = qkv[:, 2 * D_MODEL + hd * D_HEAD:2 * D_MODEL + (hd + 1) * D_HEAD]
            p = jax.nn.softmax(q @ k.T * scale, axis=-1)
            outs.append(p @ v)
        attn = jnp.concatenate(outs, axis=-1) @ lp["wout"].T + lp["bout"].reshape(-1)
        x = x + attn
        up = x @ lp["wup"].T
        x = x + jax.nn.gelu(up, approximate=False) @ lp["wdown"].T
    logits = x @ params["w_embed"].T
    return jax.nn.softmax(logits, axis=0)[None]     # softmax over the SEQ axis


if __name__ == "__main__":
    key = jax.random.PRNGKey(0)
    k_params, k_ids = jax.random.split(key)
    params = build_params(k_params)
    packed = pack_params(params)
    input_ids = jax.random.randint(k_ids, (SEQ,), 0, VOCAB, dtype=jnp.int32)

    out = transformer_forward(input_ids, packed)
    out = jax.block_until_ready(out)

    assert out.shape == (1, SEQ, VOCAB), out.shape
    # softmax over dim=1 (sequence axis) must sum to ~1 per vocab column
    colsums = jnp.sum(out, axis=1)
    assert bool(jnp.all(jnp.abs(colsums - 1.0) < 2e-3)), \
        float(jnp.max(jnp.abs(colsums - 1.0)))

    # compare against a pure-JAX f32 reference (bf16 MXU inputs => loose tol)
    ref = reference_forward(input_ids, params)
    max_err = float(jnp.max(jnp.abs(out - ref)))
    assert max_err < 5e-3, max_err
    print("KERNEL_OK")
</pallas_src>

<mosaic_0001>
module attributes {stable_mosaic.version = 11 : i64} {
  func.func @fused_forward_kernel(%arg0: i32, %arg1: memref<8xi32, #tpu.memory_space<smem>>, %arg2: memref<512x1x32xf32, #tpu.memory_space<vmem>>, %arg3: memref<2x2x96xf32, #tpu.memory_space<vmem>>, %arg4: memref<2x32x256xbf16, #tpu.memory_space<vmem>>, %arg5: memref<2x128x32xbf16, #tpu.memory_space<vmem>>, %arg6: memref<32x512xbf16, #tpu.memory_space<vmem>>, %arg7: memref<8x512xf32, #tpu.memory_space<vmem>>) attributes {dimension_semantics = [#tpu.dimension_semantics<parallel>], iteration_bounds = array<i64: 1>, scalar_prefetch = 1 : i64, scratch_operands = 0 : i64, tpu.core_type = #tpu.core_type<tc>, window_params = [{pipeline_mode = #tpu.pipeline_mode<synchronous>, transform_indices = @transform_0, window_bounds = array<i64: 512, 1, 32>}, {pipeline_mode = #tpu.pipeline_mode<synchronous>, transform_indices = @transform_1, window_bounds = array<i64: 2, 2, 96>}, {pipeline_mode = #tpu.pipeline_mode<synchronous>, transform_indices = @transform_2, window_bounds = array<i64: 2, 32, 256>}, {pipeline_mode = #tpu.pipeline_mode<synchronous>, transform_indices = @transform_3, window_bounds = array<i64: 2, 128, 32>}, {transform_indices = @transform_4, window_bounds = array<i64: 32, 512>}, {transform_indices = @transform_5, window_bounds = array<i64: 8, 512>}]} {
    %c0 = arith.constant 0 : index
    %0 = memref.load %arg1[%c0] : memref<8xi32, #tpu.memory_space<smem>>
    %1 = arith.index_cast %0 : i32 to index
    %c0_0 = arith.constant 0 : index
    %c0_1 = arith.constant 0 : index
    %2 = vector.load %arg2[%1, %c0_0, %c0_1] : memref<512x1x32xf32, #tpu.memory_space<vmem>>, vector<1x1x32xf32>
    %3 = vector.shape_cast %2 : vector<1x1x32xf32> to vector<1x32xf32>
    %c1 = arith.constant 1 : index
    %4 = memref.load %arg1[%c1] : memref<8xi32, #tpu.memory_space<smem>>
    %5 = arith.index_cast %4 : i32 to index
    %c0_2 = arith.constant 0 : index
    %c0_3 = arith.constant 0 : index
    %6 = vector.load %arg2[%5, %c0_2, %c0_3] : memref<512x1x32xf32, #tpu.memory_space<vmem>>, vector<1x1x32xf32>
    %7 = vector.shape_cast %6 : vector<1x1x32xf32> to vector<1x32xf32>
    %c2 = arith.constant 2 : index
    %8 = memref.load %arg1[%c2] : memref<8xi32, #tpu.memory_space<smem>>
    %9 = arith.index_cast %8 : i32 to index
    %c0_4 = arith.constant 0 : index
    %c0_5 = arith.constant 0 : index
    %10 = vector.load %arg2[%9, %c0_4, %c0_5] : memref<512x1x32xf32, #tpu.memory_space<vmem>>, vector<1x1x32xf32>
    %11 = vector.shape_cast %10 : vector<1x1x32xf32> to vector<1x32xf32>
    %c3 = arith.constant 3 : index
    %12 = memref.load %arg1[%c3] : memref<8xi32, #tpu.memory_space<smem>>
    %13 = arith.index_cast %12 : i32 to index
    %c0_6 = arith.constant 0 : index
    %c0_7 = arith.constant 0 : index
    %14 = vector.load %arg2[%13, %c0_6, %c0_7] : memref<512x1x32xf32, #tpu.memory_space<vmem>>, vector<1x1x32xf32>
    %15 = vector.shape_cast %14 : vector<1x1x32xf32> to vector<1x32xf32>
    %c4 = arith.constant 4 : index
    %16 = memref.load %arg1[%c4] : memref<8xi32, #tpu.memory_space<smem>>
    %17 = arith.index_cast %16 : i32 to index
    %c0_8 = arith.constant 0 : index
    %c0_9 = arith.constant 0 : index
    %18 = vector.load %arg2[%17, %c0_8, %c0_9] : memref<512x1x32xf32, #tpu.memory_space<vmem>>, vector<1x1x32xf32>
    %19 = vector.shape_cast %18 : vector<1x1x32xf32> to vector<1x32xf32>
    %c5 = arith.constant 5 : index
    %20 = memref.load %arg1[%c5] : memref<8xi32, #tpu.memory_space<smem>>
    %21 = arith.index_cast %20 : i32 to index
    %c0_10 = arith.constant 0 : index
    %c0_11 = arith.constant 0 : index
    %22 = vector.load %arg2[%21, %c0_10, %c0_11] : memref<512x1x32xf32, #tpu.memory_space<vmem>>, vector<1x1x32xf32>
    %23 = vector.shape_cast %22 : vector<1x1x32xf32> to vector<1x32xf32>
    %c6 = arith.constant 6 : index
    %24 = memref.load %arg1[%c6] : memref<8xi32, #tpu.memory_space<smem>>
    %25 = arith.index_cast %24 : i32 to index
    %c0_12 = arith.constant 0 : index
    %c0_13 = arith.constant 0 : index
    %26 = vector.load %arg2[%25, %c0_12, %c0_13] : memref<512x1x32xf32, #tpu.memory_space<vmem>>, vector<1x1x32xf32>
    %27 = vector.shape_cast %26 : vector<1x1x32xf32> to vector<1x32xf32>
    %c7 = arith.constant 7 : index
    %28 = memref.load %arg1[%c7] : memref<8xi32, #tpu.memory_space<smem>>
    %29 = arith.index_cast %28 : i32 to index
    %c0_14 = arith.constant 0 : index
    %c0_15 = arith.constant 0 : index
    %30 = vector.load %arg2[%29, %c0_14, %c0_15] : memref<512x1x32xf32, #tpu.memory_space<vmem>>, vector<1x1x32xf32>
    %31 = vector.shape_cast %30 : vector<1x1x32xf32> to vector<1x32xf32>
    %32 = tpu.concatenate %3, %7, %11, %15, %19, %23, %27, %31 in 0 : vector<1x32xf32>, vector<1x32xf32>, vector<1x32xf32>, vector<1x32xf32>, vector<1x32xf32>, vector<1x32xf32>, vector<1x32xf32>, vector<1x32xf32> -> vector<8x32xf32>
    %c0_16 = arith.constant 0 : index
    %c0_17 = arith.constant 0 : index
    %c0_18 = arith.constant 0 : index
    %33 = vector.load %arg3[%c0_16, %c0_17, %c0_18] : memref<2x2x96xf32, #tpu.memory_space<vmem>>, vector<1x2x96xf32>
    %34 = vector.shape_cast %33 : vector<1x2x96xf32> to vector<2x96xf32>
    %35 = vector.extract_strided_slice %34 {offsets = [0, 0], sizes = [1, 32], strides = [1, 1]} : vector<2x96xf32> to vector<1x32xf32>
    %36 = vector.extract_strided_slice %34 {offsets = [0, 32], sizes = [1, 32], strides = [1, 1]} : vector<2x96xf32> to vector<1x32xf32>
    %37 = vector.extract_strided_slice %34 {offsets = [0, 64], sizes = [1, 32], strides = [1, 1]} : vector<2x96xf32> to vector<1x32xf32>
    %38 = vector.extract_strided_slice %34 {offsets = [1, 0], sizes = [1, 96], strides = [1, 1]} : vector<2x96xf32> to vector<1x96xf32>
    %cst = arith.constant dense<0.000000e+00> : vector<8xf32>
    %39 = vector.multi_reduction <add>, %32, %cst [1] : vector<8x32xf32> to vector<8xf32>
    %40 = vector.shape_cast %39 : vector<8xf32> to vector<8x1xf32>
    %cst_19 = arith.constant 3.200000e+01 : f32
    %41 = vector.broadcast %cst_19 : f32 to vector<8x1xf32>
    %42 = arith.divf %40, %41 : vector<8x1xf32>
    %43 = vector.broadcast %42 : vector<8x1xf32> to vector<8x32xf32>
    %44 = arith.subf %32, %43 : vector<8x32xf32>
    %45 = arith.mulf %44, %44 : vector<8x32xf32>
    %cst_20 = arith.constant dense<0.000000e+00> : vector<8xf32>
    %46 = vector.multi_reduction <add>, %45, %cst_20 [1] : vector<8x32xf32> to vector<8xf32>
    %47 = vector.shape_cast %46 : vector<8xf32> to vector<8x1xf32>
    %cst_21 = arith.constant 3.200000e+01 : f32
    %48 = vector.broadcast %cst_21 : f32 to vector<8x1xf32>
    %49 = arith.divf %47, %48 : vector<8x1xf32>
    %50 = vector.broadcast %42 : vector<8x1xf32> to vector<8x32xf32>
    %51 = arith.subf %32, %50 : vector<8x32xf32>
    %cst_22 = arith.constant 9.99999974E-6 : f32
    %52 = vector.broadcast %cst_22 : f32 to vector<8x1xf32>
    %53 = arith.addf %49, %52 : vector<8x1xf32>
    %54 = math.rsqrt %53 : vector<8x1xf32>
    %55 = vector.broadcast %54 : vector<8x1xf32> to vector<8x32xf32>
    %56 = arith.mulf %51, %55 : vector<8x32xf32>
    %57 = vector.broadcast %35 : vector<1x32xf32> to vector<8x32xf32>
    %58 = arith.mulf %56, %57 : vector<8x32xf32>
    %59 = vector.broadcast %36 : vector<1x32xf32> to vector<8x32xf32>
    %60 = arith.addf %58, %59 : vector<8x32xf32>
    %61 = arith.truncf %60 : vector<8x32xf32> to vector<8x32xbf16>
    %c0_23 = arith.constant 0 : index
    %c0_24 = arith.constant 0 : index
    %c0_25 = arith.constant 0 : index
    %62 = vector.load %arg4[%c0_23, %c0_24, %c0_25] : memref<2x32x256xbf16, #tpu.memory_space<vmem>>, vector<1x32x96xbf16>
    %63 = vector.shape_cast %62 : vector<1x32x96xbf16> to vector<32x96xbf16>
    %cst_26 = arith.constant dense<0.000000e+00> : vector<8x96xf32>
    %64 = tpu.matmul %61, %63, %cst_26 {dimension_numbers = #tpu.dot_dimension_numbers<[1], [0], [0], [1], [0, 0, 1, 1], [], []>} : vector<8x32xbf16>, vector<32x96xbf16>, vector<8x96xf32> -> vector<8x96xf32>
    %65 = vector.broadcast %38 : vector<1x96xf32> to vector<8x96xf32>
    %66 = arith.addf %64, %65 : vector<8x96xf32>
    %67 = vector.extract_strided_slice %66 {offsets = [0, 0], sizes = [8, 8], strides = [1, 1]} : vector<8x96xf32> to vector<8x8xf32>
    %68 = arith.truncf %67 : vector<8x8xf32> to vector<8x8xbf16>
    %69 = vector.extract_strided_slice %66 {offsets = [0, 32], sizes = [8, 8], strides = [1, 1]} : vector<8x96xf32> to vector<8x8xf32>
    %70 = arith.truncf %69 : vector<8x8xf32> to vector<8x8xbf16>
    %71 = vector.extract_strided_slice %66 {offsets = [0, 64], sizes = [8, 8], strides = [1, 1]} : vector<8x96xf32> to vector<8x8xf32>
    %72 = arith.truncf %71 : vector<8x8xf32> to vector<8x8xbf16>
    %cst_27 = arith.constant dense<0.000000e+00> : vector<8x8xf32>
    %73 = tpu.matmul %68, %70, %cst_27 {dimension_numbers = #tpu.dot_dimension_numbers<[1], [1], [0], [0], [0, 0, 1, 0], [], []>} : vector<8x8xbf16>, vector<8x8xbf16>, vector<8x8xf32> -> vector<8x8xf32>
    %cst_28 = arith.constant dense<0xFF800000> : vector<8xf32>
    %74 = vector.multi_reduction <maximumf>, %73, %cst_28 [1] : vector<8x8xf32> to vector<8xf32>
    %75 = vector.shape_cast %74 : vector<8xf32> to vector<8x1xf32>
    %76 = vector.broadcast %75 : vector<8x1xf32> to vector<8x8xf32>
    %77 = arith.subf %73, %76 : vector<8x8xf32>
    %78 = math.exp %77 : vector<8x8xf32>
    %cst_29 = arith.constant dense<0.000000e+00> : vector<8xf32>
    %79 = vector.multi_reduction <add>, %78, %cst_29 [1] : vector<8x8xf32> to vector<8xf32>
    %80 = vector.shape_cast %79 : vector<8xf32> to vector<8x1xf32>
    %81 = tpu.reciprocal %80 {approx = true} : vector<8x1xf32> -> vector<8x1xf32>
    %82 = vector.broadcast %81 : vector<8x1xf32> to vector<8x8xf32>
    %83 = arith.mulf %78, %82 : vector<8x8xf32>
    %84 = arith.truncf %83 : vector<8x8xf32> to vector<8x8xbf16>
    %cst_30 = arith.constant dense<0.000000e+00> : vector<8x8xf32>
    %85 = tpu.matmul %84, %72, %cst_30 {dimension_numbers = #tpu.dot_dimension_numbers<[1], [0], [0], [1], [0, 0, 1, 1], [], []>} : vector<8x8xbf16>, vector<8x8xbf16>, vector<8x8xf32> -> vector<8x8xf32>
    %86 = vector.extract_strided_slice %66 {offsets = [0, 8], sizes = [8, 8], strides = [1, 1]} : vector<8x96xf32> to vector<8x8xf32>
    %87 = arith.truncf %86 : vector<8x8xf32> to vector<8x8xbf16>
    %88 = vector.extract_strided_slice %66 {offsets = [0, 40], sizes = [8, 8], strides = [1, 1]} : vector<8x96xf32> to vector<8x8xf32>
    %89 = arith.truncf %88 : vector<8x8xf32> to vector<8x8xbf16>
    %90 = vector.extract_strided_slice %66 {offsets = [0, 72], sizes = [8, 8], strides = [1, 1]} : vector<8x96xf32> to vector<8x8xf32>
    %91 = arith.truncf %90 : vector<8x8xf32> to vector<8x8xbf16>
    %cst_31 = arith.constant dense<0.000000e+00> : vector<8x8xf32>
    %92 = tpu.matmul %87, %89, %cst_31 {dimension_numbers = #tpu.dot_dimension_numbers<[1], [1], [0], [0], [0, 0, 1, 0], [], []>} : vector<8x8xbf16>, vector<8x8xbf16>, vector<8x8xf32> -> vector<8x8xf32>
    %cst_32 = arith.constant dense<0xFF800000> : vector<8xf32>
    %93 = vector.multi_reduction <maximumf>, %92, %cst_32 [1] : vector<8x8xf32> to vector<8xf32>
    %94 = vector.shape_cast %93 : vector<8xf32> to vector<8x1xf32>
    %95 = vector.broadcast %94 : vector<8x1xf32> to vector<8x8xf32>
    %96 = arith.subf %92, %95 : vector<8x8xf32>
    %97 = math.exp %96 : vector<8x8xf32>
    %cst_33 = arith.constant dense<0.000000e+00> : vector<8xf32>
    %98 = vector.multi_reduction <add>, %97, %cst_33 [1] : vector<8x8xf32> to vector<8xf32>
    %99 = vector.shape_cast %98 : vector<8xf32> to vector<8x1xf32>
    %100 = tpu.reciprocal %99 {approx = true} : vector<8x1xf32> -> vector<8x1xf32>
    %101 = vector.broadcast %100 : vector<8x1xf32> to vector<8x8xf32>
    %102 = arith.mulf %97, %101 : vector<8x8xf32>
    %103 = arith.truncf %102 : vector<8x8xf32> to vector<8x8xbf16>
    %cst_34 = arith.constant dense<0.000000e+00> : vector<8x8xf32>
    %104 = tpu.matmul %103, %91, %cst_34 {dimension_numbers = #tpu.dot_dimension_numbers<[1], [0], [0], [1], [0, 0, 1, 1], [], []>} : vector<8x8xbf16>, vector<8x8xbf16>, vector<8x8xf32> -> vector<8x8xf32>
    %105 = vector.extract_strided_slice %66 {offsets = [0, 16], sizes = [8, 8], strides = [1, 1]} : vector<8x96xf32> to vector<8x8xf32>
    %106 = arith.truncf %105 : vector<8x8xf32> to vector<8x8xbf16>
    %107 = vector.extract_strided_slice %66 {offsets = [0, 48], sizes = [8, 8], strides = [1, 1]} : vector<8x96xf32> to vector<8x8xf32>
    %108 = arith.truncf %107 : vector<8x8xf32> to vector<8x8xbf16>
    %109 = vector.extract_strided_slice %66 {offsets = [0, 80], sizes = [8, 8], strides = [1, 1]} : vector<8x96xf32> to vector<8x8xf32>
    %110 = arith.truncf %109 : vector<8x8xf32> to vector<8x8xbf16>
    %cst_35 = arith.constant dense<0.000000e+00> : vector<8x8xf32>
    %111 = tpu.matmul %106, %108, %cst_35 {dimension_numbers = #tpu.dot_dimension_numbers<[1], [1], [0], [0], [0, 0, 1, 0], [], []>} : vector<8x8xbf16>, vector<8x8xbf16>, vector<8x8xf32> -> vector<8x8xf32>
    %cst_36 = arith.constant dense<0xFF800000> : vector<8xf32>
    %112 = vector.multi_reduction <maximumf>, %111, %cst_36 [1] : vector<8x8xf32> to vector<8xf32>
    %113 = vector.shape_cast %112 : vector<8xf32> to vector<8x1xf32>
    %114 = vector.broadcast %113 : vector<8x1xf32> to vector<8x8xf32>
    %115 = arith.subf %111, %114 : vector<8x8xf32>
    %116 = math.exp %115 : vector<8x8xf32>
    %cst_37 = arith.constant dense<0.000000e+00> : vector<8xf32>
    %117 = vector.multi_reduction <add>, %116, %cst_37 [1] : vector<8x8xf32> to vector<8xf32>
    %118 = vector.shape_cast %117 : vector<8xf32> to vector<8x1xf32>
    %119 = tpu.reciprocal %118 {approx = true} : vector<8x1xf32> -> vector<8x1xf32>
    %120 = vector.broadcast %119 : vector<8x1xf32> to vector<8x8xf32>
    %121 = arith.mulf %116, %120 : vector<8x8xf32>
    %122 = arith.truncf %121 : vector<8x8xf32> to vector<8x8xbf16>
    %cst_38 = arith.constant dense<0.000000e+00> : vector<8x8xf32>
    %123 = tpu.matmul %122, %110, %cst_38 {dimension_numbers = #tpu.dot_dimension_numbers<[1], [0], [0], [1], [0, 0, 1, 1], [], []>} : vector<8x8xbf16>, vector<8x8xbf16>, vector<8x8xf32> -> vector<8x8xf32>
    %124 = vector.extract_strided_slice %66 {offsets = [0, 24], sizes = [8, 8], strides = [1, 1]} : vector<8x96xf32> to vector<8x8xf32>
    %125 = arith.truncf %124 : vector<8x8xf32> to vector<8x8xbf16>
    %126 = vector.extract_strided_slice %66 {offsets = [0, 56], sizes = [8, 8], strides = [1, 1]} : vector<8x96xf32> to vector<8x8xf32>
    %127 = arith.truncf %126 : vector<8x8xf32> to vector<8x8xbf16>
    %128 = vector.extract_strided_slice %66 {offsets = [0, 88], sizes = [8, 8], strides = [1, 1]} : vector<8x96xf32> to vector<8x8xf32>
    %129 = arith.truncf %128 : vector<8x8xf32> to vector<8x8xbf16>
    %cst_39 = arith.constant dense<0.000000e+00> : vector<8x8xf32>
    %130 = tpu.matmul %125, %127, %cst_39 {dimension_numbers = #tpu.dot_dimension_numbers<[1], [1], [0], [0], [0, 0, 1, 0], [], []>} : vector<8x8xbf16>, vector<8x8xbf16>, vector<8x8xf32> -> vector<8x8xf32>
    %cst_40 = arith.constant dense<0xFF800000> : vector<8xf32>
    %131 = vector.multi_reduction <maximumf>, %130, %cst_40 [1] : vector<8x8xf32> to vector<8xf32>
    %132 = vector.shape_cast %131 : vector<8xf32> to vector<8x1xf32>
    %133 = vector.broadcast %132 : vector<8x1xf32> to vector<8x8xf32>
    %134 = arith.subf %130, %133 : vector<8x8xf32>
    %135 = math.exp %134 : vector<8x8xf32>
    %cst_41 = arith.constant dense<0.000000e+00> : vector<8xf32>
    %136 = vector.multi_reduction <add>, %135, %cst_41 [1] : vector<8x8xf32> to vector<8xf32>
    %137 = vector.shape_cast %136 : vector<8xf32> to vector<8x1xf32>
    %138 = tpu.reciprocal %137 {approx = true} : vector<8x1xf32> -> vector<8x1xf32>
    %139 = vector.broadcast %138 : vector<8x1xf32> to vector<8x8xf32>
    %140 = arith.mulf %135, %139 : vector<8x8xf32>
    %141 = arith.truncf %140 : vector<8x8xf32> to vector<8x8xbf16>
    %cst_42 = arith.constant dense<0.000000e+00> : vector<8x8xf32>
    %142 = tpu.matmul %141, %129, %cst_42 {dimension_numbers = #tpu.dot_dimension_numbers<[1], [0], [0], [1], [0, 0, 1, 1], [], []>} : vector<8x8xbf16>, vector<8x8xbf16>, vector<8x8xf32> -> vector<8x8xf32>
    %143 = tpu.concatenate %85, %104, %123, %142 in 1 : vector<8x8xf32>, vector<8x8xf32>, vector<8x8xf32>, vector<8x8xf32> -> vector<8x32xf32>
    %144 = arith.truncf %143 : vector<8x32xf32> to vector<8x32xbf16>
    %c0_43 = arith.constant 0 : index
    %c0_44 = arith.constant 0 : index
    %c96 = arith.constant 96 : index
    %145 = vector.load %arg4[%c0_43, %c0_44, %c96] : memref<2x32x256xbf16, #tpu.memory_space<vmem>>, vector<1x32x32xbf16>
    %146 = vector.shape_cast %145 : vector<1x32x32xbf16> to vector<32x32xbf16>
    %cst_45 = arith.constant dense<0.000000e+00> : vector<8x32xf32>
    %147 = tpu.matmul %144, %146, %cst_45 {dimension_numbers = #tpu.dot_dimension_numbers<[1], [0], [0], [1], [0, 0, 1, 1], [], []>} : vector<8x32xbf16>, vector<32x32xbf16>, vector<8x32xf32> -> vector<8x32xf32>
    %148 = vector.broadcast %37 : vector<1x32xf32> to vector<8x32xf32>
    %149 = arith.addf %147, %148 : vector<8x32xf32>
    %150 = arith.addf %32, %149 : vector<8x32xf32>
    %151 = arith.truncf %150 : vector<8x32xf32> to vector<8x32xbf16>
    %c0_46 = arith.constant 0 : index
    %c0_47 = arith.constant 0 : index
    %c128 = arith.constant 128 : index
    %152 = vector.load %arg4[%c0_46, %c0_47, %c128] : memref<2x32x256xbf16, #tpu.memory_space<vmem>>, vector<1x32x128xbf16>
    %153 = vector.shape_cast %152 : vector<1x32x128xbf16> to vector<32x128xbf16>
    %cst_48 = arith.constant dense<0.000000e+00> : vector<8x128xf32>
    %154 = tpu.matmul %151, %153, %cst_48 {dimension_numbers = #tpu.dot_dimension_numbers<[1], [0], [0], [1], [0, 0, 1, 1], [], []>} : vector<8x32xbf16>, vector<32x128xbf16>, vector<8x128xf32> -> vector<8x128xf32>
    %cst_49 = arith.constant 5.000000e-01 : f32
    %155 = vector.broadcast %cst_49 : f32 to vector<8x128xf32>
    %156 = arith.mulf %155, %154 : vector<8x128xf32>
    %cst_50 = arith.constant 0.707106769 : f32
    %157 = vector.broadcast %cst_50 : f32 to vector<8x128xf32>
    %158 = arith.mulf %154, %157 : vector<8x128xf32>
    %cst_51 = arith.constant 0.000000e+00 : f32
    %159 = vector.broadcast %cst_51 : f32 to vector<8x128xf32>
    %160 = arith.cmpf oge, %158, %159 : vector<8x128xf32>
    %cst_52 = arith.constant 1.000000e+00 : f32
    %cst_53 = arith.constant -1.000000e+00 : f32
    %161 = vector.broadcast %cst_52 : f32 to vector<8x128xf32>
    %162 = vector.broadcast %cst_53 : f32 to vector<8x128xf32>
    %163 = arith.select %160, %161, %162 : vector<8x128xi1>, vector<8x128xf32>
    %164 = math.absf %158 : vector<8x128xf32>
    %cst_54 = arith.constant 0.327591091 : f32
    %165 = vector.broadcast %cst_54 : f32 to vector<8x128xf32>
    %166 = arith.mulf %165, %164 : vector<8x128xf32>
    %cst_55 = arith.constant 1.000000e+00 : f32
    %167 = vector.broadcast %cst_55 : f32 to vector<8x128xf32>
    %168 = arith.addf %167, %166 : vector<8x128xf32>
    %cst_56 = arith.constant 1.000000e+00 : f32
    %169 = vector.broadcast %cst_56 : f32 to vector<8x128xf32>
    %170 = arith.divf %169, %168 : vector<8x128xf32>
    %cst_57 = arith.constant 1.06140542 : f32
    %171 = vector.broadcast %cst_57 : f32 to vector<8x128xf32>
    %172 = arith.mulf %171, %170 : vector<8x128xf32>
    %cst_58 = arith.constant -1.45315206 : f32
    %173 = vector.broadcast %cst_58 : f32 to vector<8x128xf32>
    %174 = arith.addf %172, %173 : vector<8x128xf32>
    %175 = arith.mulf %174, %170 : vector<8x128xf32>
    %cst_59 = arith.constant 1.42141378 : f32
    %176 = vector.broadcast %cst_59 : f32 to vector<8x128xf32>
    %177 = arith.addf %175, %176 : vector<8x128xf32>
    %178 = arith.mulf %177, %170 : vector<8x128xf32>
    %cst_60 = arith.constant -0.284496725 : f32
    %179 = vector.broadcast %cst_60 : f32 to vector<8x128xf32>
    %180 = arith.addf %178, %179 : vector<8x128xf32>
    %181 = arith.mulf %180, %170 : vector<8x128xf32>
    %cst_61 = arith.constant 0.254829586 : f32
    %182 = vector.broadcast %cst_61 : f32 to vector<8x128xf32>
    %183 = arith.addf %181, %182 : vector<8x128xf32>
    %184 = arith.mulf %183, %170 : vector<8x128xf32>
    %cst_62 = arith.constant 0.000000e+00 : f32
    %185 = vector.broadcast %cst_62 : f32 to vector<8x128xf32>
    %186 = arith.subf %185, %164 : vector<8x128xf32>
    %187 = arith.mulf %186, %164 : vector<8x128xf32>
    %188 = math.exp %187 : vector<8x128xf32>
    %189 = arith.mulf %184, %188 : vector<8x128xf32>
    %cst_63 = arith.constant 1.000000e+00 : f32
    %190 = vector.broadcast %cst_63 : f32 to vector<8x128xf32>
    %191 = arith.subf %190, %189 : vector<8x128xf32>
    %192 = arith.mulf %163, %191 : vector<8x128xf32>
    %cst_64 = arith.constant 1.000000e+00 : f32
    %193 = vector.broadcast %cst_64 : f32 to vector<8x128xf32>
    %194 = arith.addf %193, %192 : vector<8x128xf32>
    %195 = arith.mulf %156, %194 : vector<8x128xf32>
    %196 = arith.truncf %195 : vector<8x128xf32> to vector<8x128xbf16>
    %c0_65 = arith.constant 0 : index
    %c0_66 = arith.constant 0 : index
    %c0_67 = arith.constant 0 : index
    %197 = vector.load %arg5[%c0_65, %c0_66, %c0_67] : memref<2x128x32xbf16, #tpu.memory_space<vmem>>, vector<1x128x32xbf16>
    %198 = vector.shape_cast %197 : vector<1x128x32xbf16> to vector<128x32xbf16>
    %cst_68 = arith.constant dense<0.000000e+00> : vector<8x32xf32>
    %199 = tpu.matmul %196, %198, %cst_68 {dimension_numbers = #tpu.dot_dimension_numbers<[1], [0], [0], [1], [0, 0, 1, 1], [], []>} : vector<8x128xbf16>, vector<128x32xbf16>, vector<8x32xf32> -> vector<8x32xf32>
    %200 = arith.addf %150, %199 : vector<8x32xf32>
    %c1_69 = arith.constant 1 : index
    %c0_70 = arith.constant 0 : index
    %c0_71 = arith.constant 0 : index
    %201 = vector.load %arg3[%c1_69, %c0_70, %c0_71] : memref<2x2x96xf32, #tpu.memory_space<vmem>>, vector<1x2x96xf32>
    %202 = vector.shape_cast %201 : vector<1x2x96xf32> to vector<2x96xf32>
    %203 = vector.extract_strided_slice %202 {offsets = [0, 0], sizes = [1, 32], strides = [1, 1]} : vector<2x96xf32> to vector<1x32xf32>
    %204 = vector.extract_strided_slice %202 {offsets = [0, 32], sizes = [1, 32], strides = [1, 1]} : vector<2x96xf32> to vector<1x32xf32>
    %205 = vector.extract_strided_slice %202 {offsets = [0, 64], sizes = [1, 32], strides = [1, 1]} : vector<2x96xf32> to vector<1x32xf32>
    %206 = vector.extract_strided_slice %202 {offsets = [1, 0], sizes = [1, 96], strides = [1, 1]} : vector<2x96xf32> to vector<1x96xf32>
    %cst_72 = arith.constant dense<0.000000e+00> : vector<8xf32>
    %207 = vector.multi_reduction <add>, %200, %cst_72 [1] : vector<8x32xf32> to vector<8xf32>
    %208 = vector.shape_cast %207 : vector<8xf32> to vector<8x1xf32>
    %cst_73 = arith.constant 3.200000e+01 : f32
    %209 = vector.broadcast %cst_73 : f32 to vector<8x1xf32>
    %210 = arith.divf %208, %209 : vector<8x1xf32>
    %211 = vector.broadcast %210 : vector<8x1xf32> to vector<8x32xf32>
    %212 = arith.subf %200, %211 : vector<8x32xf32>
    %213 = arith.mulf %212, %212 : vector<8x32xf32>
    %cst_74 = arith.constant dense<0.000000e+00> : vector<8xf32>
    %214 = vector.multi_reduction <add>, %213, %cst_74 [1] : vector<8x32xf32> to vector<8xf32>
    %215 = vector.shape_cast %214 : vector<8xf32> to vector<8x1xf32>
    %cst_75 = arith.constant 3.200000e+01 : f32
    %216 = vector.broadcast %cst_75 : f32 to vector<8x1xf32>
    %217 = arith.divf %215, %216 : vector<8x1xf32>
    %218 = vector.broadcast %210 : vector<8x1xf32> to vector<8x32xf32>
    %219 = arith.subf %200, %218 : vector<8x32xf32>
    %cst_76 = arith.constant 9.99999974E-6 : f32
    %220 = vector.broadcast %cst_76 : f32 to vector<8x1xf32>
    %221 = arith.addf %217, %220 : vector<8x1xf32>
    %222 = math.rsqrt %221 : vector<8x1xf32>
    %223 = vector.broadcast %222 : vector<8x1xf32> to vector<8x32xf32>
    %224 = arith.mulf %219, %223 : vector<8x32xf32>
    %225 = vector.broadcast %203 : vector<1x32xf32> to vector<8x32xf32>
    %226 = arith.mulf %224, %225 : vector<8x32xf32>
    %227 = vector.broadcast %204 : vector<1x32xf32> to vector<8x32xf32>
    %228 = arith.addf %226, %227 : vector<8x32xf32>
    %229 = arith.truncf %228 : vector<8x32xf32> to vector<8x32xbf16>
    %c1_77 = arith.constant 1 : index
    %c0_78 = arith.constant 0 : index
    %c0_79 = arith.constant 0 : index
    %230 = vector.load %arg4[%c1_77, %c0_78, %c0_79] : memref<2x32x256xbf16, #tpu.memory_space<vmem>>, vector<1x32x96xbf16>
    %231 = vector.shape_cast %230 : vector<1x32x96xbf16> to vector<32x96xbf16>
    %cst_80 = arith.constant dense<0.000000e+00> : vector<8x96xf32>
    %232 = tpu.matmul %229, %231, %cst_80 {dimension_numbers = #tpu.dot_dimension_numbers<[1], [0], [0], [1], [0, 0, 1, 1], [], []>} : vector<8x32xbf16>, vector<32x96xbf16>, vector<8x96xf32> -> vector<8x96xf32>
    %233 = vector.broadcast %206 : vector<1x96xf32> to vector<8x96xf32>
    %234 = arith.addf %232, %233 : vector<8x96xf32>
    %235 = vector.extract_strided_slice %234 {offsets = [0, 0], sizes = [8, 8], strides = [1, 1]} : vector<8x96xf32> to vector<8x8xf32>
    %236 = arith.truncf %235 : vector<8x8xf32> to vector<8x8xbf16>
    %237 = vector.extract_strided_slice %234 {offsets = [0, 32], sizes = [8, 8], strides = [1, 1]} : vector<8x96xf32> to vector<8x8xf32>
    %238 = arith.truncf %237 : vector<8x8xf32> to vector<8x8xbf16>
    %239 = vector.extract_strided_slice %234 {offsets = [0, 64], sizes = [8, 8], strides = [1, 1]} : vector<8x96xf32> to vector<8x8xf32>
    %240 = arith.truncf %239 : vector<8x8xf32> to vector<8x8xbf16>
    %cst_81 = arith.constant dense<0.000000e+00> : vector<8x8xf32>
    %241 = tpu.matmul %236, %238, %cst_81 {dimension_numbers = #tpu.dot_dimension_numbers<[1], [1], [0], [0], [0, 0, 1, 0], [], []>} : vector<8x8xbf16>, vector<8x8xbf16>, vector<8x8xf32> -> vector<8x8xf32>
    %cst_82 = arith.constant dense<0xFF800000> : vector<8xf32>
    %242 = vector.multi_reduction <maximumf>, %241, %cst_82 [1] : vector<8x8xf32> to vector<8xf32>
    %243 = vector.shape_cast %242 : vector<8xf32> to vector<8x1xf32>
    %244 = vector.broadcast %243 : vector<8x1xf32> to vector<8x8xf32>
    %245 = arith.subf %241, %244 : vector<8x8xf32>
    %246 = math.exp %245 : vector<8x8xf32>
    %cst_83 = arith.constant dense<0.000000e+00> : vector<8xf32>
    %247 = vector.multi_reduction <add>, %246, %cst_83 [1] : vector<8x8xf32> to vector<8xf32>
    %248 = vector.shape_cast %247 : vector<8xf32> to vector<8x1xf32>
    %249 = tpu.reciprocal %248 {approx = true} : vector<8x1xf32> -> vector<8x1xf32>
    %250 = vector.broadcast %249 : vector<8x1xf32> to vector<8x8xf32>
    %251 = arith.mulf %246, %250 : vector<8x8xf32>
    %252 = arith.truncf %251 : vector<8x8xf32> to vector<8x8xbf16>
    %cst_84 = arith.constant dense<0.000000e+00> : vector<8x8xf32>
    %253 = tpu.matmul %252, %240, %cst_84 {dimension_numbers = #tpu.dot_dimension_numbers<[1], [0], [0], [1], [0, 0, 1, 1], [], []>} : vector<8x8xbf16>, vector<8x8xbf16>, vector<8x8xf32> -> vector<8x8xf32>
    %254 = vector.extract_strided_slice %234 {offsets = [0, 8], sizes = [8, 8], strides = [1, 1]} : vector<8x96xf32> to vector<8x8xf32>
    %255 = arith.truncf %254 : vector<8x8xf32> to vector<8x8xbf16>
    %256 = vector.extract_strided_slice %234 {offsets = [0, 40], sizes = [8, 8], strides = [1, 1]} : vector<8x96xf32> to vector<8x8xf32>
    %257 = arith.truncf %256 : vector<8x8xf32> to vector<8x8xbf16>
    %258 = vector.extract_strided_slice %234 {offsets = [0, 72], sizes = [8, 8], strides = [1, 1]} : vector<8x96xf32> to vector<8x8xf32>
    %259 = arith.truncf %258 : vector<8x8xf32> to vector<8x8xbf16>
    %cst_85 = arith.constant dense<0.000000e+00> : vector<8x8xf32>
    %260 = tpu.matmul %255, %257, %cst_85 {dimension_numbers = #tpu.dot_dimension_numbers<[1], [1], [0], [0], [0, 0, 1, 0], [], []>} : vector<8x8xbf16>, vector<8x8xbf16>, vector<8x8xf32> -> vector<8x8xf32>
    %cst_86 = arith.constant dense<0xFF800000> : vector<8xf32>
    %261 = vector.multi_reduction <maximumf>, %260, %cst_86 [1] : vector<8x8xf32> to vector<8xf32>
    %262 = vector.shape_cast %261 : vector<8xf32> to vector<8x1xf32>
    %263 = vector.broadcast %262 : vector<8x1xf32> to vector<8x8xf32>
    %264 = arith.subf %260, %263 : vector<8x8xf32>
    %265 = math.exp %264 : vector<8x8xf32>
    %cst_87 = arith.constant dense<0.000000e+00> : vector<8xf32>
    %266 = vector.multi_reduction <add>, %265, %cst_87 [1] : vector<8x8xf32> to vector<8xf32>
    %267 = vector.shape_cast %266 : vector<8xf32> to vector<8x1xf32>
    %268 = tpu.reciprocal %267 {approx = true} : vector<8x1xf32> -> vector<8x1xf32>
    %269 = vector.broadcast %268 : vector<8x1xf32> to vector<8x8xf32>
    %270 = arith.mulf %265, %269 : vector<8x8xf32>
    %271 = arith.truncf %270 : vector<8x8xf32> to vector<8x8xbf16>
    %cst_88 = arith.constant dense<0.000000e+00> : vector<8x8xf32>
    %272 = tpu.matmul %271, %259, %cst_88 {dimension_numbers = #tpu.dot_dimension_numbers<[1], [0], [0], [1], [0, 0, 1, 1], [], []>} : vector<8x8xbf16>, vector<8x8xbf16>, vector<8x8xf32> -> vector<8x8xf32>
    %273 = vector.extract_strided_slice %234 {offsets = [0, 16], sizes = [8, 8], strides = [1, 1]} : vector<8x96xf32> to vector<8x8xf32>
    %274 = arith.truncf %273 : vector<8x8xf32> to vector<8x8xbf16>
    %275 = vector.extract_strided_slice %234 {offsets = [0, 48], sizes = [8, 8], strides = [1, 1]} : vector<8x96xf32> to vector<8x8xf32>
    %276 = arith.truncf %275 : vector<8x8xf32> to vector<8x8xbf16>
    %277 = vector.extract_strided_slice %234 {offsets = [0, 80], sizes = [8, 8], strides = [1, 1]} : vector<8x96xf32> to vector<8x8xf32>
    %278 = arith.truncf %277 : vector<8x8xf32> to vector<8x8xbf16>
    %cst_89 = arith.constant dense<0.000000e+00> : vector<8x8xf32>
    %279 = tpu.matmul %274, %276, %cst_89 {dimension_numbers = #tpu.dot_dimension_numbers<[1], [1], [0], [0], [0, 0, 1, 0], [], []>} : vector<8x8xbf16>, vector<8x8xbf16>, vector<8x8xf32> -> vector<8x8xf32>
    %cst_90 = arith.constant dense<0xFF800000> : vector<8xf32>
    %280 = vector.multi_reduction <maximumf>, %279, %cst_90 [1] : vector<8x8xf32> to vector<8xf32>
    %281 = vector.shape_cast %280 : vector<8xf32> to vector<8x1xf32>
    %282 = vector.broadcast %281 : vector<8x1xf32> to vector<8x8xf32>
    %283 = arith.subf %279, %282 : vector<8x8xf32>
    %284 = math.exp %283 : vector<8x8xf32>
    %cst_91 = arith.constant dense<0.000000e+00> : vector<8xf32>
    %285 = vector.multi_reduction <add>, %284, %cst_91 [1] : vector<8x8xf32> to vector<8xf32>
    %286 = vector.shape_cast %285 : vector<8xf32> to vector<8x1xf32>
    %287 = tpu.reciprocal %286 {approx = true} : vector<8x1xf32> -> vector<8x1xf32>
    %288 = vector.broadcast %287 : vector<8x1xf32> to vector<8x8xf32>
    %289 = arith.mulf %284, %288 : vector<8x8xf32>
    %290 = arith.truncf %289 : vector<8x8xf32> to vector<8x8xbf16>
    %cst_92 = arith.constant dense<0.000000e+00> : vector<8x8xf32>
    %291 = tpu.matmul %290, %278, %cst_92 {dimension_numbers = #tpu.dot_dimension_numbers<[1], [0], [0], [1], [0, 0, 1, 1], [], []>} : vector<8x8xbf16>, vector<8x8xbf16>, vector<8x8xf32> -> vector<8x8xf32>
    %292 = vector.extract_strided_slice %234 {offsets = [0, 24], sizes = [8, 8], strides = [1, 1]} : vector<8x96xf32> to vector<8x8xf32>
    %293 = arith.truncf %292 : vector<8x8xf32> to vector<8x8xbf16>
    %294 = vector.extract_strided_slice %234 {offsets = [0, 56], sizes = [8, 8], strides = [1, 1]} : vector<8x96xf32> to vector<8x8xf32>
    %295 = arith.truncf %294 : vector<8x8xf32> to vector<8x8xbf16>
    %296 = vector.extract_strided_slice %234 {offsets = [0, 88], sizes = [8, 8], strides = [1, 1]} : vector<8x96xf32> to vector<8x8xf32>
    %297 = arith.truncf %296 : vector<8x8xf32> to vector<8x8xbf16>
    %cst_93 = arith.constant dense<0.000000e+00> : vector<8x8xf32>
    %298 = tpu.matmul %293, %295, %cst_93 {dimension_numbers = #tpu.dot_dimension_numbers<[1], [1], [0], [0], [0, 0, 1, 0], [], []>} : vector<8x8xbf16>, vector<8x8xbf16>, vector<8x8xf32> -> vector<8x8xf32>
    %cst_94 = arith.constant dense<0xFF800000> : vector<8xf32>
    %299 = vector.multi_reduction <maximumf>, %298, %cst_94 [1] : vector<8x8xf32> to vector<8xf32>
    %300 = vector.shape_cast %299 : vector<8xf32> to vector<8x1xf32>
    %301 = vector.broadcast %300 : vector<8x1xf32> to vector<8x8xf32>
    %302 = arith.subf %298, %301 : vector<8x8xf32>
    %303 = math.exp %302 : vector<8x8xf32>
    %cst_95 = arith.constant dense<0.000000e+00> : vector<8xf32>
    %304 = vector.multi_reduction <add>, %303, %cst_95 [1] : vector<8x8xf32> to vector<8xf32>
    %305 = vector.shape_cast %304 : vector<8xf32> to vector<8x1xf32>
    %306 = tpu.reciprocal %305 {approx = true} : vector<8x1xf32> -> vector<8x1xf32>
    %307 = vector.broadcast %306 : vector<8x1xf32> to vector<8x8xf32>
    %308 = arith.mulf %303, %307 : vector<8x8xf32>
    %309 = arith.truncf %308 : vector<8x8xf32> to vector<8x8xbf16>
    %cst_96 = arith.constant dense<0.000000e+00> : vector<8x8xf32>
    %310 = tpu.matmul %309, %297, %cst_96 {dimension_numbers = #tpu.dot_dimension_numbers<[1], [0], [0], [1], [0, 0, 1, 1], [], []>} : vector<8x8xbf16>, vector<8x8xbf16>, vector<8x8xf32> -> vector<8x8xf32>
    %311 = tpu.concatenate %253, %272, %291, %310 in 1 : vector<8x8xf32>, vector<8x8xf32>, vector<8x8xf32>, vector<8x8xf32> -> vector<8x32xf32>
    %312 = arith.truncf %311 : vector<8x32xf32> to vector<8x32xbf16>
    %c1_97 = arith.constant 1 : index
    %c0_98 = arith.constant 0 : index
    %c96_99 = arith.constant 96 : index
    %313 = vector.load %arg4[%c1_97, %c0_98, %c96_99] : memref<2x32x256xbf16, #tpu.memory_space<vmem>>, vector<1x32x32xbf16>
    %314 = vector.shape_cast %313 : vector<1x32x32xbf16> to vector<32x32xbf16>
    %cst_100 = arith.constant dense<0.000000e+00> : vector<8x32xf32>
    %315 = tpu.matmul %312, %314, %cst_100 {dimension_numbers = #tpu.dot_dimension_numbers<[1], [0], [0], [1], [0, 0, 1, 1], [], []>} : vector<8x32xbf16>, vector<32x32xbf16>, vector<8x32xf32> -> vector<8x32xf32>
    %316 = vector.broadcast %205 : vector<1x32xf32> to vector<8x32xf32>
    %317 = arith.addf %315, %316 : vector<8x32xf32>
    %318 = arith.addf %200, %317 : vector<8x32xf32>
    %319 = arith.truncf %318 : vector<8x32xf32> to vector<8x32xbf16>
    %c1_101 = arith.constant 1 : index
    %c0_102 = arith.constant 0 : index
    %c128_103 = arith.constant 128 : index
    %320 = vector.load %arg4[%c1_101, %c0_102, %c128_103] : memref<2x32x256xbf16, #tpu.memory_space<vmem>>, vector<1x32x128xbf16>
    %321 = vector.shape_cast %320 : vector<1x32x128xbf16> to vector<32x128xbf16>
    %cst_104 = arith.constant dense<0.000000e+00> : vector<8x128xf32>
    %322 = tpu.matmul %319, %321, %cst_104 {dimension_numbers = #tpu.dot_dimension_numbers<[1], [0], [0], [1], [0, 0, 1, 1], [], []>} : vector<8x32xbf16>, vector<32x128xbf16>, vector<8x128xf32> -> vector<8x128xf32>
    %cst_105 = arith.constant 5.000000e-01 : f32
    %323 = vector.broadcast %cst_105 : f32 to vector<8x128xf32>
    %324 = arith.mulf %323, %322 : vector<8x128xf32>
    %cst_106 = arith.constant 0.707106769 : f32
    %325 = vector.broadcast %cst_106 : f32 to vector<8x128xf32>
    %326 = arith.mulf %322, %325 : vector<8x128xf32>
    %cst_107 = arith.constant 0.000000e+00 : f32
    %327 = vector.broadcast %cst_107 : f32 to vector<8x128xf32>
    %328 = arith.cmpf oge, %326, %327 : vector<8x128xf32>
    %cst_108 = arith.constant 1.000000e+00 : f32
    %cst_109 = arith.constant -1.000000e+00 : f32
    %329 = vector.broadcast %cst_108 : f32 to vector<8x128xf32>
    %330 = vector.broadcast %cst_109 : f32 to vector<8x128xf32>
    %331 = arith.select %328, %329, %330 : vector<8x128xi1>, vector<8x128xf32>
    %332 = math.absf %326 : vector<8x128xf32>
    %cst_110 = arith.constant 0.327591091 : f32
    %333 = vector.broadcast %cst_110 : f32 to vector<8x128xf32>
    %334 = arith.mulf %333, %332 : vector<8x128xf32>
    %cst_111 = arith.constant 1.000000e+00 : f32
    %335 = vector.broadcast %cst_111 : f32 to vector<8x128xf32>
    %336 = arith.addf %335, %334 : vector<8x128xf32>
    %cst_112 = arith.constant 1.000000e+00 : f32
    %337 = vector.broadcast %cst_112 : f32 to vector<8x128xf32>
    %338 = arith.divf %337, %336 : vector<8x128xf32>
    %cst_113 = arith.constant 1.06140542 : f32
    %339 = vector.broadcast %cst_113 : f32 to vector<8x128xf32>
    %340 = arith.mulf %339, %338 : vector<8x128xf32>
    %cst_114 = arith.constant -1.45315206 : f32
    %341 = vector.broadcast %cst_114 : f32 to vector<8x128xf32>
    %342 = arith.addf %340, %341 : vector<8x128xf32>
    %343 = arith.mulf %342, %338 : vector<8x128xf32>
    %cst_115 = arith.constant 1.42141378 : f32
    %344 = vector.broadcast %cst_115 : f32 to vector<8x128xf32>
    %345 = arith.addf %343, %344 : vector<8x128xf32>
    %346 = arith.mulf %345, %338 : vector<8x128xf32>
    %cst_116 = arith.constant -0.284496725 : f32
    %347 = vector.broadcast %cst_116 : f32 to vector<8x128xf32>
    %348 = arith.addf %346, %347 : vector<8x128xf32>
    %349 = arith.mulf %348, %338 : vector<8x128xf32>
    %cst_117 = arith.constant 0.254829586 : f32
    %350 = vector.broadcast %cst_117 : f32 to vector<8x128xf32>
    %351 = arith.addf %349, %350 : vector<8x128xf32>
    %352 = arith.mulf %351, %338 : vector<8x128xf32>
    %cst_118 = arith.constant 0.000000e+00 : f32
    %353 = vector.broadcast %cst_118 : f32 to vector<8x128xf32>
    %354 = arith.subf %353, %332 : vector<8x128xf32>
    %355 = arith.mulf %354, %332 : vector<8x128xf32>
    %356 = math.exp %355 : vector<8x128xf32>
    %357 = arith.mulf %352, %356 : vector<8x128xf32>
    %cst_119 = arith.constant 1.000000e+00 : f32
    %358 = vector.broadcast %cst_119 : f32 to vector<8x128xf32>
    %359 = arith.subf %358, %357 : vector<8x128xf32>
    %360 = arith.mulf %331, %359 : vector<8x128xf32>
    %cst_120 = arith.constant 1.000000e+00 : f32
    %361 = vector.broadcast %cst_120 : f32 to vector<8x128xf32>
    %362 = arith.addf %361, %360 : vector<8x128xf32>
    %363 = arith.mulf %324, %362 : vector<8x128xf32>
    %364 = arith.truncf %363 : vector<8x128xf32> to vector<8x128xbf16>
    %c1_121 = arith.constant 1 : index
    %c0_122 = arith.constant 0 : index
    %c0_123 = arith.constant 0 : index
    %365 = vector.load %arg5[%c1_121, %c0_122, %c0_123] : memref<2x128x32xbf16, #tpu.memory_space<vmem>>, vector<1x128x32xbf16>
    %366 = vector.shape_cast %365 : vector<1x128x32xbf16> to vector<128x32xbf16>
    %cst_124 = arith.constant dense<0.000000e+00> : vector<8x32xf32>
    %367 = tpu.matmul %364, %366, %cst_124 {dimension_numbers = #tpu.dot_dimension_numbers<[1], [0], [0], [1], [0, 0, 1, 1], [], []>} : vector<8x128xbf16>, vector<128x32xbf16>, vector<8x32xf32> -> vector<8x32xf32>
    %368 = arith.addf %318, %367 : vector<8x32xf32>
    %369 = arith.truncf %368 : vector<8x32xf32> to vector<8x32xbf16>
    %c0_125 = arith.constant 0 : index
    %c0_126 = arith.constant 0 : index
    %370 = vector.load %arg6[%c0_125, %c0_126] : memref<32x512xbf16, #tpu.memory_space<vmem>>, vector<32x512xbf16>
    %cst_127 = arith.constant dense<0.000000e+00> : vector<8x512xf32>
    %371 = tpu.matmul %369, %370, %cst_127 {dimension_numbers = #tpu.dot_dimension_numbers<[1], [0], [0], [1], [0, 0, 1, 1], [], []>} : vector<8x32xbf16>, vector<32x512xbf16>, vector<8x512xf32> -> vector<8x512xf32>
    %cst_128 = arith.constant dense<0xFF800000> : vector<512xf32>
    %372 = vector.multi_reduction <maximumf>, %371, %cst_128 [0] : vector<8x512xf32> to vector<512xf32>
    %373 = vector.shape_cast %372 : vector<512xf32> to vector<1x512xf32>
    %374 = vector.broadcast %373 : vector<1x512xf32> to vector<8x512xf32>
    %375 = arith.subf %371, %374 : vector<8x512xf32>
    %376 = math.exp %375 : vector<8x512xf32>
    %cst_129 = arith.constant dense<0.000000e+00> : vector<512xf32>
    %377 = vector.multi_reduction <add>, %376, %cst_129 [0] : vector<8x512xf32> to vector<512xf32>
    %378 = vector.shape_cast %377 : vector<512xf32> to vector<1x512xf32>
    %379 = tpu.reciprocal %378 {approx = true} : vector<1x512xf32> -> vector<1x512xf32>
    %380 = vector.broadcast %379 : vector<1x512xf32> to vector<8x512xf32>
    %381 = arith.mulf %376, %380 : vector<8x512xf32>
    %c0_130 = arith.constant 0 : index
    %c0_131 = arith.constant 0 : index
    %382 = vector.load %arg7[%c0_130, %c0_131] : memref<8x512xf32, #tpu.memory_space<vmem>>, vector<8x512xf32>
    tpu.vector_store %arg7[%c0_130, %c0_131], %381 {strides = array<i32>} : memref<8x512xf32, #tpu.memory_space<vmem>>, vector<8x512xf32>,
    return
  }
  func.func @transform_0(%arg0: i32, %arg1: memref<8xi32, #tpu.memory_space<smem>>) -> (i32, i32, i32) {
    %c0_i32 = arith.constant 0 : i32
    %c0_i32_0 = arith.constant 0 : i32
    %c0_i32_1 = arith.constant 0 : i32
    %c0_i32_2 = arith.constant 0 : i32
    return %c0_i32, %c0_i32_0, %c0_i32_1 : i32, i32, i32
  }
  func.func @transform_1(%arg0: i32, %arg1: memref<8xi32, #tpu.memory_space<smem>>) -> (i32, i32, i32) {
    %c0_i32 = arith.constant 0 : i32
    %c0_i32_0 = arith.constant 0 : i32
    %c0_i32_1 = arith.constant 0 : i32
    %c0_i32_2 = arith.constant 0 : i32
    return %c0_i32, %c0_i32_0, %c0_i32_1 : i32, i32, i32
  }
  func.func @transform_2(%arg0: i32, %arg1: memref<8xi32, #tpu.memory_space<smem>>) -> (i32, i32, i32) {
    %c0_i32 = arith.constant 0 : i32
    %c0_i32_0 = arith.constant 0 : i32
    %c0_i32_1 = arith.constant 0 : i32
    %c0_i32_2 = arith.constant 0 : i32
    return %c0_i32, %c0_i32_0, %c0_i32_1 : i32, i32, i32
  }
  func.func @transform_3(%arg0: i32, %arg1: memref<8xi32, #tpu.memory_space<smem>>) -> (i32, i32, i32) {
    %c0_i32 = arith.constant 0 : i32
    %c0_i32_0 = arith.constant 0 : i32
    %c0_i32_1 = arith.constant 0 : i32
    %c0_i32_2 = arith.constant 0 : i32
    return %c0_i32, %c0_i32_0, %c0_i32_1 : i32, i32, i32
  }
  func.func @transform_4(%arg0: i32, %arg1: memref<8xi32, #tpu.memory_space<smem>>) -> (i32, i32) {
    %c0_i32 = arith.constant 0 : i32
    %c0_i32_0 = arith.constant 0 : i32
    return %c0_i32, %arg0 : i32, i32
  }
  func.func @transform_5(%arg0: i32, %arg1: memref<8xi32, #tpu.memory_space<smem>>) -> (i32, i32) {
    %c0_i32 = arith.constant 0 : i32
    %c0_i32_0 = arith.constant 0 : i32
    return %c0_i32, %arg0 : i32, i32
  }
}

</mosaic_0001>

<bundles_post_ra>
// kernel: tpu_custom_call.1
= control target key start
LH: loop header
LB: loop body
LE: loop exit
PB: predicated region body
PF: predicated region fallthrough
CT: control target
= control target key end

     0   :  { %s2905_s0 = inlined_call_operand.vmem [shape: s32[8], index: 0, kind: input, shape index: {}]   ;;  %s2906_s1 = inlined_call_operand.vmem [shape: f32[512,1,32], index: 1, kind: input, shape index: {}]   ;;  %s2907_s2 = inlined_call_operand.vmem [shape: f32[2,2,96], index: 2, kind: input, shape index: {}]   ;;  %s2908_s3 = inlined_call_operand.vmem [shape: bf16[2,32,256], index: 3, kind: input, shape index: {}]   ;;  %s2909_s4 = inlined_call_operand.vmem [shape: bf16[2,128,32], index: 4, kind: input, shape index: {}]   ;;  %s2910_s5 = inlined_call_operand.vmem [shape: bf16[32,512], index: 5, kind: input, shape index: {}]   ;;  %s2911_s6 = inlined_call_operand.hbm [shape: f32[8,512], index: 6, kind: output, shape index: {}]  }
   0x1   :  { %s11_s23 = sshll.u32 %s2905_s0, 4  ;;  %s12_s23 = int_to_ptr.vmem [resolvable:$true] %s11_s23 }
   0x2   :  { %s2389_s24 = scalar_lea.vmem %s12_s23, 16  ;;  %p2394_p1 = scmp.lt.s32.totalorder %s12_s23, %s12_s23 }
   0x3   :  { %p2390_p0 = scmp.ne.s32.totalorder %s12_s23, %s2389_s24  ;;  %p2395_p2 = scmp.lt.s32.totalorder %s2389_s24, %s2389_s24 }
   0x5   :  { %p2396_p3 = por %p2395_p2, %p2394_p1 }
   0x7   :  { %p2397_p4 = pnand %p2396_p3, %p2390_p0 }
   0x9   :  { %2400 = shalt.err (!%p2397_p4)  }
   0xa   :  { %s2425_s25 = smov [#allocation3]  }
   0xb   :  { %14 = dma.vmem_to_smem %s12_s23, 16, %s2425_s25, [#allocation2] }
   0xc   :  { %2421 = dma.done.wait [#allocation2], 16 }
   0xd   :  { %2422 = vsyncadd [#allocation2], 4294967280 }
   0xe   :  { %16 = sfence }
   0xf   :  { %s29_s26 = sld [smem:[#allocation3]]  ;;  %vm95_vm0 = vcmask 1040384   ;;  %vm97_vm1 = vcmask 1041408   ;;  %vm99_vm2 = vcmask 1042432   ;;  %vm101_vm3 = vcmask 1043456  }
  0x10   :  { %s1925_s27 = sld [smem:[#allocation3 + $0x1]]  ;;  %vm103_vm4 = vcmask 1044480   ;;  %vm105_vm5 = vcmask 1045504   ;;  %vm107_vm6 = vcmask 1046528   ;;  %vm110_vm7 = vcmask 261120  }
  0x11   :  { %s1926_s0 = sld [smem:[#allocation3 + $0x2]] }
  0x12   :  { %s1927_s28 = sld [smem:[#allocation3 + $0x3]] }
  0x13   :  { %s1928_s29 = sld [smem:[#allocation3 + $0x4]] }
  0x14   :  { %s1929_s30 = sld [smem:[#allocation3 + $0x5]] }
  0x15   :  { %s30_s9 = scalar_lea.vmem %s2906_s1, %s29_s26  ;;  %s1930_s10 = sld [smem:[#allocation3 + $0x6]] }
  0x16   :  { %v31_v0 = vld [vmem:[%s30_s9] sm:$0x1]  ;;  %s33_s13 = scalar_lea.vmem %s2906_s1, %s1925_s27  ;;  %s1931_s14 = sld [smem:[#allocation3 + $0x7]] }
  0x17   :  { %v1932_v1 = vld [vmem:[%s33_s13] ss:$0 sm:$0xff]  ;;  %s36_s17 = scalar_lea.vmem %s2906_s1, %s1926_s0 }
  0x18   :  { %v1933_v2 = vld [vmem:[%s36_s17] ss:$0 sm:$0xff]  ;;  %s39_s20 = scalar_lea.vmem %s2906_s1, %s1927_s28  ;;  %v96_v3 = vsel %vm95_vm0, %v31_v0, %v1932_v1 }
  0x19   :  { %v1934_v4 = vld [vmem:[%s39_s20] ss:$0 sm:$0xff]  ;;  %s42_s23 = scalar_lea.vmem %s2906_s1, %s1928_s29  ;;  %v98_v5 = vsel %vm97_vm1, %v96_v3, %v1933_v2 }
  0x1a   :  { %v1935_v6 = vld [vmem:[%s42_s23] ss:$0 sm:$0xff]  ;;  %s45_s26 = scalar_lea.vmem %s2906_s1, %s1929_s30  ;;  %v100_v7 = vsel %vm99_vm2, %v98_v5, %v1934_v4 }
  0x1b   :  { %v1936_v8 = vld [vmem:[%s45_s26] ss:$0 sm:$0xff]  ;;  %s48_s28 = scalar_lea.vmem %s2906_s1, %s1930_s10  ;;  %v102_v9 = vsel %vm101_vm3, %v100_v7, %v1935_v6 }
  0x1c   :  { %v1937_v10 = vld [vmem:[%s48_s28] ss:$0 sm:$0xff]  ;;  %s51_s29 = scalar_lea.vmem %s2906_s1, %s1931_s14  ;;  %v104_v11 = vsel %vm103_vm4, %v102_v9, %v1936_v8 }
  0x1d   :  { %v1938_v12 = vld [vmem:[%s51_s29] ss:$0 sm:$0xff]  ;;  %v106_v13 = vsel %vm105_vm5, %v104_v11, %v1937_v10 }
  0x1e   :  { %v2515_v14 = vsel %vm107_vm6, %v106_v13, %v1938_v12 }
  0x1f   :  { %v111_v15 = vsel %vm110_vm7, %v2515_v14, 0.0 }
  0x20   :  { %112 = vadd.xlane.f32.xlu0 %v111_v15 }
  0x21   :  { %17 = vsyncpa [#allocation5], 0  ;;  %v125_v16 = vlaneseq  ;;  %v109_v18 = vld [vmem:[%s2907_s2] sm:$0x3]  ;;  %s2426_s1 = smov 96   ;;  %v2427_v27 = vmov 0.0  }
  0x22   :  { %v2536_v26 = vld [vmem:[%s2908_s3 + $0x10] ss:$8 sps:$4 sm:$0xff]   ;;  %2088 = vmatprep.subr.bf16.mxu1 %v2427_v27  ;;  %2102 = vmatprep.subr.bf16.mxu0 %v2427_v27  ;;  %v2545_v28 = vld [vmem:[%s2908_s3] ss:$8 sps:$4 sm:$0xff]   ;;  %vm2428_vm8 = vmmov 0   ;;  %s2429_s14 = smov 88  }
  0x23   :  { %v2519_v17 = vshrl.u32 %v125_v16, 7  ;;  %2089 = vmatpush3.bf16.msra.mxu1 %v2536_v26  ;;  %2092 = vmatprep.mubr.msk.bf16.mxu1 %vm2428_vm8, %v2427_v27  ;;  %s2430_s15 = smov 120   ;;  %s2431_s16 = smov 80   ;;  %vm203_vm9 = vcmask 64512   ;;  %vm653_vm10 = vcmask 130048   ;;  %vm655_vm11 = vcmask 195584  }
  0x24   :  { %2090 = vmatprep.subr.bf16.mxu1 %v2427_v27  ;;  %2104 = vmatprep.mubr.msk.bf16.mxu0 %vm2428_vm8, %v2427_v27  ;;  %s2432_s17 = smov 112   ;;  %s2433_s18 = smov 72  }
  0x25   :  { %v127_v19 = vsub.s32 0, %v2519_v17  ;;  %v142_v38 = vsub.s32 1, %v2519_v17  ;;  %s2434_s19 = smov 104   ;;  %s2435_s20 = smov 56  }
  0x26   :  { %s2436_s21 = smov 64   ;;  %s2437_s22 = smov 40  }
  0x27   :  { %v2527_v20 = vrot.slane %v109_v18, %v127_v19  ;;  %2091 = vmatpush3.bf16.msra.mxu1 %v2545_v28  ;;  %v143_v39 = vrot.slane %v109_v18, %v142_v38  ;;  %s2438_s23 = smov 48   ;;  %s2439_s24 = smov 32  }
  0x28   :  { %2096 = vmatprep.subr.bf16.mxu1 %v2427_v27  ;;  %s2440_s25 = smov 8   ;;  %s2441_s26 = smov 16  }
  0x29   :  { %131 = vrot.lane.b32.xlu1 %v2527_v20, %s2426_s1  ;;  %s2442_s28 = smov 24  }
  0x9b   :  { %v132_v34 = vpop.permute.xlu1 %131 }
  0xa9   :  { %v113_v21 = vpop.xlane.xlu0 %112 }
  0xaa   :  { %v115_v22 = vmul.f32 0.03125, %v113_v21 }
  0xac   :  { %v116_v23 = vsub.f32 %v2515_v14, %v115_v22 }
  0xae   :  { %v117_v24 = vmul.f32 %v116_v23, %v116_v23 }
  0xb0   :  { %v118_v25 = vsel %vm110_vm7, %v117_v24, 0.0 }
  0xb1   :  { %119 = vadd.xlane.f32.xlu0 %v118_v25 }
 0x13a   :  { %v120_v29 = vpop.xlane.xlu0 %119 }
 0x13b   :  { %v121_v30 = vmul.f32 0.03125, %v120_v29 }
 0x13d   :  { %v122_v31 = vadd.f32 1e-05, %v121_v30 }
 0x13f   :  { %2329 = vrsqrt.f32 %v122_v31 }
 0x14c   :  { %v2330_v32 = vpop.eup %2329 }
 0x14d   :  { %v124_v33 = vmul.f32 %v2330_v32, %v116_v23 }
 0x14f   :  { %v129_v35 = vmul.f32 %v2527_v20, %v124_v33 }
 0x151   :  { %v134_v36 = vadd.f32 %v132_v34, %v129_v35 }
 0x153   :  { %v135_v37 = vpack.c.bf16 %v134_v36, %v134_v36 }
 0x155   :  { %2093 = vmatmul.mubr.msk.bf16.vlgmr.msra.gmra.mxu1 %vm110_vm7, %v135_v37 }
 0x156   :  { %2098 = vmatprep.mubr.msk.bf16.mxu1 %vm2428_vm8, %v2427_v27 }
 0x215   :  { %v193_v40 = vpop.f32.mrf.mxu1 }
 0x216   :  { %v194_v41 = vadd.f32 %v193_v40, %v143_v39 }
 0x217   :  { %v2094_v42 = vpop.f32.mrf.mxu1 }
 0x218   :  { %v2560_v43 = vpack.c.bf16 %v194_v41, %v194_v41 }
 0x219   :  { %v196_v44 = vpop.f32.mrf.mxu1 }
 0x21a   :  { %312 = vrot.lane.b32.xlu0 %v2560_v43, %s2429_s14  ;;  %201 = vrot.lane.b32.xlu1 %v2560_v43, %s2426_s1 }
 0x21b   :  { %v2095_v45 = vpop.f32.mrf.mxu1 }
 0x21e   :  { %310 = vrot.lane.b32.xlu1 %v2560_v43, %s2430_s15 }
 0x222   :  { %422 = vrot.lane.b32.xlu1 %v2560_v43, %s2431_s16 }
 0x226   :  { %420 = vrot.lane.b32.xlu1 %v2560_v43, %s2432_s17 }
 0x22a   :  { %532 = vrot.lane.b32.xlu1 %v2560_v43, %s2433_s18 }
 0x22e   :  { %530 = vrot.lane.b32.xlu1 %v2560_v43, %s2434_s19 }
 0x28c   :  { %v202_v46 = vpop.permute.xlu1 %201  ;;  %v313_v49 = vpop.permute.xlu0 %312 }
 0x28d   :  { %v208_v47 = vsel %vm203_vm9, %v202_v46, 0  ;;  %v318_v50 = vsel %vm203_vm9, %v313_v49, 0 }
 0x28e   :  { %2097 = vmatpush3.bf16.xpose.msra.mxu1 %v208_v47 }
 0x28f   :  { %2108 = vmatprep.subr.bf16.mxu1 %v2427_v27 }
 0x290   :  { %v311_v48 = vpop.permute.xlu1 %310 }
 0x294   :  { %v423_v51 = vpop.permute.xlu1 %422 }
 0x295   :  { %2099 = vmatmul.mubr.msk.bf16.vlgmr.msra.gmra.mxu1 %vm203_vm9, %v2560_v43  ;;  %v428_v53 = vsel %vm203_vm9, %v423_v51, 0 }
 0x296   :  { %2109 = vmatpush3.bf16.xpose.msra.mxu1 %v318_v50  ;;  %2110 = vmatprep.mubr.msk.bf16.mxu1 %vm2428_vm8, %v2427_v27 }
 0x297   :  { %2120 = vmatprep.subr.bf16.mxu1 %v2427_v27 }
 0x298   :  { %v421_v52 = vpop.permute.xlu1 %420 }
 0x29c   :  { %v533_v54 = vpop.permute.xlu1 %532 }
 0x29d   :  { %2111 = vmatmul.mubr.msk.bf16.vlgmr.msra.gmra.mxu1 %vm203_vm9, %v311_v48  ;;  %v538_v55 = vsel %vm203_vm9, %v533_v54, 0 }
 0x29e   :  { %2121 = vmatpush3.bf16.xpose.msra.mxu1 %v428_v53  ;;  %2122 = vmatprep.mubr.msk.bf16.mxu1 %vm2428_vm8, %v2427_v27 }
 0x29f   :  { %2132 = vmatprep.subr.bf16.mxu1 %v2427_v27 }
 0x2a0   :  { %v531_v56 = vpop.permute.xlu1 %530 }
 0x2a5   :  { %2123 = vmatmul.mubr.msk.bf16.vlgmr.msra.gmra.mxu1 %vm203_vm9, %v421_v52 }
 0x2a6   :  { %2133 = vmatpush3.bf16.xpose.msra.mxu1 %v538_v55  ;;  %2134 = vmatprep.mubr.msk.bf16.mxu1 %vm2428_vm8, %v2427_v27 }
 0x2a7   :  { %2144 = vmatprep.subr.bf16.mxu1 %v2427_v27 }
 0x2ad   :  { %2135 = vmatmul.mubr.msk.bf16.vlgmr.msra.gmra.mxu1 %vm203_vm9, %v531_v56 }
 0x2ae   :  { %2148 = vmatprep.mubr.msk.bf16.mxu1 %vm2428_vm8, %v2427_v27 }
 0x355   :  { %v244_v57 = vpop.f32.mrf.mxu1 }
 0x356   :  { %v250_v58 = vsel %vm203_vm9, %v244_v57, -inf }
 0x357   :  { %251 = vmax.xlane.f32.xlu1 %v250_v58  ;;  %v2100_v59 = vpop.f32.mrf.mxu1 }
 0x359   :  { %v247_v60 = vpop.f32.mrf.mxu1 }
 0x35b   :  { %v2101_v61 = vpop.f32.mrf.mxu1 }
 0x35d   :  { %v354_v62 = vpop.f32.mrf.mxu1 }
 0x35e   :  { %v360_v63 = vsel %vm203_vm9, %v354_v62, -inf }
 0x35f   :  { %361 = vmax.xlane.f32.xlu0 %v360_v63  ;;  %v2112_v0 = vpop.f32.mrf.mxu1 }
 0x361   :  { %v357_v1 = vpop.f32.mrf.mxu1 }
 0x363   :  { %v2113_v2 = vpop.f32.mrf.mxu1 }
 0x365   :  { %v464_v3 = vpop.f32.mrf.mxu1 }
 0x366   :  { %v470_v4 = vsel %vm203_vm9, %v464_v3, -inf }
 0x367   :  { %471 = vmax.xlane.f32.xlu0 %v470_v4  ;;  %v2124_v5 = vpop.f32.mrf.mxu1 }
 0x369   :  { %v467_v6 = vpop.f32.mrf.mxu1 }
 0x36b   :  { %v2125_v7 = vpop.f32.mrf.mxu1 }
 0x36d   :  { %v574_v8 = vpop.f32.mrf.mxu1 }
 0x36e   :  { %v580_v9 = vsel %vm203_vm9, %v574_v8, -inf }
 0x36f   :  { %581 = vmax.xlane.f32.xlu1 %v580_v9  ;;  %v2136_v10 = vpop.f32.mrf.mxu1 }
 0x371   :  { %v577_v11 = vpop.f32.mrf.mxu1 }
 0x373   :  { %v2137_v12 = vpop.f32.mrf.mxu1 }
 0x3e0   :  { %v252_v13 = vpop.xlane.xlu1 %251 }
 0x3e1   :  { %v253_v15 = vsub.f32 %v244_v57, %v252_v13 }
 0x3e3   :  { %v254_v16 = vmul.f32 1.442695, %v253_v15 }
 0x3e5   :  { %2331 = vpow2.f32 %v254_v16 }
 0x3e8   :  { %v362_v18 = vpop.xlane.xlu0 %361 }
 0x3e9   :  { %v363_v21 = vsub.f32 %v354_v62, %v362_v18 }
 0x3eb   :  { %v364_v22 = vmul.f32 1.442695, %v363_v21 }
 0x3ed   :  { %2333 = vpow2.f32 %v364_v22 }
 0x3f0   :  { %v472_v23 = vpop.xlane.xlu0 %471 }
 0x3f1   :  { %v473_v24 = vsub.f32 %v464_v3, %v472_v23 }
 0x3f2   :  { %v2332_v25 = vpop.eup %2331 }
 0x3f3   :  { %v474_v29 = vmul.f32 1.442695, %v473_v24  ;;  %v256_v30 = vsel %vm203_vm9, %v2332_v25, 0.0 }
 0x3f4   :  { %257 = vadd.xlane.f32.xlu0 %v256_v30 }
 0x3f5   :  { %2335 = vpow2.f32 %v474_v29 }
 0x3f8   :  { %v582_v35 = vpop.xlane.xlu1 %581 }
 0x3f9   :  { %v583_v36 = vsub.f32 %v574_v8, %v582_v35 }
 0x3fa   :  { %v2334_v31 = vpop.eup %2333 }
 0x3fb   :  { %v366_v32 = vsel %vm203_vm9, %v2334_v31, 0.0  ;;  %v584_v37 = vmul.f32 1.442695, %v583_v36 }
 0x3fc   :  { %367 = vadd.xlane.f32.xlu1 %v366_v32 }
 0x3fd   :  { %2337 = vpow2.f32 %v584_v37 }
 0x402   :  { %v2336_v33 = vpop.eup %2335 }
 0x403   :  { %v476_v34 = vsel %vm203_vm9, %v2336_v33, 0.0 }
 0x404   :  { %477 = vadd.xlane.f32.xlu0 %v476_v34 }
 0x40a   :  { %v2338_v39 = vpop.eup %2337 }
 0x40b   :  { %v586_v40 = vsel %vm203_vm9, %v2338_v39, 0.0 }
 0x40d   :  { %372 = vrot.lane.b32.xlu1 %v2560_v43, %s2435_s20 }
 0x41a   :  { %262 = vrot.lane.b32.xlu0 %v2560_v43, %s2436_s21 }
 0x41e   :  { %592 = vrot.lane.b32.xlu0 %v2560_v43, %s2437_s22 }
 0x431   :  { %587 = vadd.xlane.f32.xlu1 %v586_v40 }
 0x442   :  { %482 = vrot.lane.b32.xlu1 %v2560_v43, %s2438_s23 }
 0x446   :  { %660 = vrot.lane.b32.xlu1 %v2536_v26, %s2439_s24  ;;  %v2295_v26 = vld [vmem:[%s2908_s3 + $0x14] ss:$8 sps:$4 sm:$0xff]  }
 0x47d   :  { %v258_v41 = vpop.xlane.xlu0 %257 }
 0x47e   :  { %2339 = vrcp.f32 %v258_v41  ;;  %v2297_v41 = vld [vmem:[%s2909_s4 + $0x38] sm:$0xff]  }
 0x485   :  { %v368_v42 = vpop.xlane.xlu1 %367 }
 0x486   :  { %2341 = vrcp.f32 %v368_v42  ;;  %v2299_v42 = vld [vmem:[%s2909_s4 + $0x28] sm:$0xff]  }
 0x489   :  { %v373_v49 = vpop.permute.xlu1 %372 }
 0x48a   :  { %v378_v52 = vsel %vm101_vm3, %v373_v49, 0 }
 0x48b   :  { %v2340_v44 = vpop.eup %2339 }
 0x48c   :  { %v260_v46 = vmul.f32 %v2340_v44, %v2332_v25  ;;  %v2300_v44 = vld [vmem:[%s2909_s4 + $0x20] sm:$0xff]  }
 0x48d   :  { %v478_v45 = vpop.xlane.xlu0 %477 }
 0x48e   :  { %v261_v50 = vpack.c.bf16 %v260_v46, %v260_v46  ;;  %2343 = vrcp.f32 %v478_v45  ;;  %v2301_v45 = vld [vmem:[%s2909_s4 + $0x18] sm:$0xff]   ;;  %v2302_v46 = vld [vmem:[%s2909_s4 + $0x10] sm:$0xff]  }
 0x491   :  { %v263_v47 = vpop.permute.xlu0 %262 }
 0x492   :  { %v268_v48 = vsel %vm101_vm3, %v263_v47, 0  ;;  %v2303_v47 = vld [vmem:[%s2909_s4 + $0x8] sm:$0xff]  }
 0x493   :  { %2103 = vmatpush3.bf16.msra.mxu0 %v268_v48  ;;  %v2342_v51 = vpop.eup %2341  ;;  %v2304_v48 = vld [vmem:[%s2909_s4] sm:$0xff]  }
 0x494   :  { %2114 = vmatprep.subr.bf16.mxu0 %v2427_v27  ;;  %v370_v43 = vmul.f32 %v2342_v51, %v2334_v31 }
 0x495   :  { %v593_v59 = vpop.permute.xlu0 %592 }
 0x496   :  { %2105 = vmatmul.mubr.msk.bf16.vlgmr.msra.gmra.mxu0 %vm203_vm9, %v261_v50  ;;  %v371_v53 = vpack.c.bf16 %v370_v43, %v370_v43  ;;  %v598_v61 = vsel %vm101_vm3, %v593_v59, 0 }
 0x497   :  { %2115 = vmatpush3.bf16.msra.mxu0 %v378_v52  ;;  %2116 = vmatprep.mubr.msk.bf16.mxu0 %vm2428_vm8, %v2427_v27 }
 0x498   :  { %2126 = vmatprep.subr.bf16.mxu0 %v2427_v27 }
 0x49b   :  { %v2344_v54 = vpop.eup %2343 }
 0x49c   :  { %v480_v56 = vmul.f32 %v2344_v54, %v2336_v33 }
 0x49e   :  { %2117 = vmatmul.mubr.msk.bf16.vlgmr.msra.gmra.mxu0 %vm203_vm9, %v371_v53  ;;  %v481_v60 = vpack.c.bf16 %v480_v56, %v480_v56 }
 0x49f   :  { %2128 = vmatprep.mubr.msk.bf16.mxu0 %vm2428_vm8, %v2427_v27 }
 0x4ba   :  { %v588_v55 = vpop.xlane.xlu1 %587 }
 0x4bb   :  { %2345 = vrcp.f32 %v588_v55 }
 0x4be   :  { %v483_v57 = vpop.permute.xlu1 %482 }
 0x4bf   :  { %v488_v58 = vsel %vm101_vm3, %v483_v57, 0 }
 0x4c0   :  { %2127 = vmatpush3.bf16.msra.mxu0 %v488_v58 }
 0x4c1   :  { %2138 = vmatprep.subr.bf16.mxu0 %v2427_v27 }
 0x4c2   :  { %v661_v2 = vpop.permute.xlu1 %660 }
 0x4c3   :  { %2129 = vmatmul.mubr.msk.bf16.vlgmr.msra.gmra.mxu0 %vm203_vm9, %v481_v60  ;;  %2145 = vmatpush3.bf16.msra.mxu1 %v661_v2 }
 0x4c4   :  { %2139 = vmatpush3.bf16.msra.mxu0 %v598_v61  ;;  %2140 = vmatprep.mubr.msk.bf16.mxu0 %vm2428_vm8, %v2427_v27 }
 0x4c5   :  { %2152 = vmatprep.subr.bf16.mxu0 %v2427_v27  ;;  %2146 = vmatprep.subr.bf16.mxu1 %v2427_v27 }
 0x4c8   :  { %v2346_v62 = vpop.eup %2345 }
 0x4c9   :  { %v590_v63 = vmul.f32 %v2346_v62, %v2338_v39 }
 0x4cb   :  { %v591_v0 = vpack.c.bf16 %v590_v63, %v590_v63 }
 0x4cd   :  { %2141 = vmatmul.mubr.msk.bf16.vlgmr.msra.gmra.mxu0 %vm203_vm9, %v591_v0 }
 0x4ce   :  { %2156 = vmatprep.mubr.msk.bf16.mxu0 %vm2428_vm8, %v2427_v27  ;;  %2153 = vmatpush3.bf16.msra.mxu0 %v2295_v26 }
 0x4cf   :  { %2154 = vmatprep.subr.bf16.mxu0 %v2427_v27 }
 0x556   :  { %v304_v1 = vpop.f32.mrf.mxu0 }
 0x558   :  { %v2106_v3 = vpop.f32.mrf.mxu0 }
 0x55a   :  { %v307_v4 = vpop.f32.mrf.mxu0 }
 0x55c   :  { %v2107_v5 = vpop.f32.mrf.mxu0 }
 0x55e   :  { %v414_v6 = vpop.f32.mrf.mxu0 }
 0x55f   :  { %641 = vrot.lane.b32.xlu0 %v414_v6, %s2440_s25 }
 0x560   :  { %v2118_v7 = vpop.f32.mrf.mxu0 }
 0x562   :  { %v417_v8 = vpop.f32.mrf.mxu0 }
 0x563   :  { %v2443_v8 = vmov -1.0  }
 0x564   :  { %v2119_v9 = vpop.f32.mrf.mxu0 }
 0x583   :  { %v524_v10 = vpop.f32.mrf.mxu0 }
 0x584   :  { %645 = vrot.lane.b32.xlu1 %v524_v10, %s2441_s26 }
 0x585   :  { %v2130_v11 = vpop.f32.mrf.mxu0 }
 0x587   :  { %v527_v12 = vpop.f32.mrf.mxu0 }
 0x588   :  { %658 = vrot.lane.b32.xlu1 %v2545_v28, %s2439_s24 }
 0x589   :  { %v2131_v13 = vpop.f32.mrf.mxu0 }
 0x58d   :  { %v634_v15 = vpop.f32.mrf.mxu0 }
 0x58e   :  { %649 = vrot.lane.b32.xlu0 %v634_v15, %s2442_s28 }
 0x58f   :  { %v2142_v16 = vpop.f32.mrf.mxu0 }
 0x591   :  { %v637_v18 = vpop.f32.mrf.mxu0 }
 0x592   :  { %664 = vrot.lane.b32.xlu0 %v2527_v20, %s2436_s21  ;;  %v2296_v20 = vld [vmem:[%s2908_s3 + $0x4] ss:$8 sps:$4 sm:$0xff]  }
 0x593   :  { %v2143_v21 = vpop.f32.mrf.mxu0  ;;  %2155 = vmatpush3.bf16.msra.mxu0 %v2296_v20  ;;  %v1962_v20 = vld [vmem:[%s2907_s2 + $0x2] sm:$0x3] }
 0x594   :  { %2180 = vmatprep.subr.bf16.mxu0 %v2427_v27 }
 0x5d1   :  { %v642_v24 = vpop.permute.xlu0 %641 }
 0x5d2   :  { %v652_v28 = vsel %vm203_vm9, %v304_v1, %v642_v24 }
 0x5f6   :  { %v646_v22 = vpop.permute.xlu1 %645 }
 0x5f7   :  { %v654_v25 = vsel %vm653_vm10, %v652_v28, %v646_v22 }
 0x5fa   :  { %v659_v23 = vpop.permute.xlu1 %658 }
 0x5fb   :  { %2147 = vmatpush3.bf16.msra.mxu1 %v659_v23 }
 0x5fc   :  { %2160 = vmatprep.subr.bf16.mxu1 %v2427_v27 }
 0x600   :  { %v650_v29 = vpop.permute.xlu0 %649 }
 0x601   :  { %v656_v30 = vsel %vm655_vm11, %v654_v25, %v650_v29 }
 0x602   :  { %v657_v31 = vpack.c.bf16 %v656_v30, %v656_v30 }
 0x604   :  { %2149 = vmatmul.mubr.msk.bf16.vlgmr.msra.gmra.mxu1 %vm110_vm7, %v657_v31  ;;  %v665_v32 = vpop.permute.xlu0 %664  ;;  %v2711_v31 = vld [vmem:[%s2908_s3 + $0x30] ss:$8 sps:$4 sm:$0xff]  }
 0x605   :  { %2176 = vmatprep.mubr.msk.bf16.mxu1 %vm2428_vm8, %v2427_v27  ;;  %2161 = vmatpush3.bf16.msra.mxu1 %v2297_v41 }
 0x606   :  { %2162 = vmatprep.subr.bf16.mxu1 %v2427_v27 }
 0x6c4   :  { %v704_v33 = vpop.f32.mrf.mxu1 }
 0x6c5   :  { %v705_v34 = vadd.f32 %v704_v33, %v665_v32  ;;  %v2720_v32 = vrot.slane %v1962_v20, %v127_v19  ;;  %v2727_v33 = vld [vmem:[%s2908_s3 + $0x20] ss:$8 sps:$4 sm:$0xff]  }
 0x6c6   :  { %v2150_v35 = vpop.f32.mrf.mxu1 }
 0x6c7   :  { %v2659_v36 = vadd.f32 %v705_v34, %v2515_v14  ;;  %v2298_v14 = vld [vmem:[%s2909_s4 + $0x30] sm:$0xff]  }
 0x6c8   :  { %v707_v37 = vpop.f32.mrf.mxu1  ;;  %2163 = vmatpush3.bf16.msra.mxu1 %v2298_v14 }
 0x6c9   :  { %v711_v39 = vpack.c.bf16 %v2659_v36, %v2659_v36  ;;  %2164 = vmatprep.subr.bf16.mxu1 %v2427_v27 }
 0x6ca   :  { %v2151_v40 = vpop.f32.mrf.mxu1 }
 0x6cb   :  { %2157 = vmatmul.mubr.msk.bf16.vlgmr.msra.gmra.mxu0 %vm110_vm7, %v711_v39 }
 0x6cc   :  { %2184 = vmatprep.mubr.msk.bf16.mxu0 %vm2428_vm8, %v2427_v27  ;;  %2165 = vmatpush3.bf16.msra.mxu1 %v2299_v42  ;;  %v938_v42 = vrot.slane %v1962_v20, %v142_v38 }
 0x6cd   :  { %2166 = vmatprep.subr.bf16.mxu1 %v2427_v27  ;;  %2181 = vmatpush3.bf16.msra.mxu0 %v2711_v31 }
 0x6ce   :  { %2182 = vmatprep.subr.bf16.mxu0 %v2427_v27 }
 0x6d0   :  { %2167 = vmatpush3.bf16.msra.mxu1 %v2300_v44 }
 0x6d1   :  { %2168 = vmatprep.subr.bf16.mxu1 %v2427_v27  ;;  %2183 = vmatpush3.bf16.msra.mxu0 %v2727_v33 }
 0x6d2   :  { %2188 = vmatprep.subr.bf16.mxu0 %v2427_v27 }
 0x6d4   :  { %2169 = vmatpush3.bf16.msra.mxu1 %v2301_v45 }
 0x6d5   :  { %2170 = vmatprep.subr.bf16.mxu1 %v2427_v27 }
 0x6d8   :  { %2171 = vmatpush3.bf16.msra.mxu1 %v2302_v46 }
 0x6d9   :  { %2172 = vmatprep.subr.bf16.mxu1 %v2427_v27 }
 0x6dc   :  { %2173 = vmatpush3.bf16.msra.mxu1 %v2303_v47 }
 0x6dd   :  { %2174 = vmatprep.subr.bf16.mxu1 %v2427_v27 }
 0x6e0   :  { %2175 = vmatpush3.bf16.msra.mxu1 %v2304_v48 }
 0x6e1   :  { %2206 = vmatprep.subr.bf16.mxu1 %v2427_v27 }
 0x78b   :  { %v765_v49 = vpop.f32.mrf.mxu0 }
 0x78c   :  { %v772_v50 = vmul.f32 0.70710677, %v765_v49  ;;  %v771_v26 = vmul.f32 0.5, %v765_v49 }
 0x78d   :  { %v2158_v51 = vpop.f32.mrf.mxu0 }
 0x78e   :  { %v775_v52 = vand.u32 2147483647, %v772_v50  ;;  %vm773_vm12 = vcmp.ge.f32.partialorder %v772_v50, 0.0 }
 0x78f   :  { %v768_v43 = vpop.f32.mrf.mxu0  ;;  %v774_v9 = vsel %vm773_vm12, 1.0, %v2443_v8 }
 0x790   :  { %v776_v53 = vmul.f32 0.3275911, %v775_v52  ;;  %v789_v56 = vsub.f32 0.0, %v775_v52 }
 0x791   :  { %v2159_v54 = vpop.f32.mrf.mxu0 }
 0x792   :  { %v777_v55 = vadd.f32 1.0, %v776_v53  ;;  %v790_v57 = vmul.f32 %v789_v56, %v775_v52 }
 0x794   :  { %2347 = vrcp.f32 %v777_v55  ;;  %v791_v60 = vmul.f32 1.442695, %v790_v57 }
 0x796   :  { %2349 = vpow2.f32 %v791_v60 }
 0x7a1   :  { %v2348_v58 = vpop.eup %2347 }
 0x7a2   :  { %v780_v59 = vmul.f32 1.0614054, %v2348_v58 }
 0x7a3   :  { %v2350_v5 = vpop.eup %2349 }
 0x7a4   :  { %v781_v61 = vadd.f32 -1.4531521, %v780_v59 }
 0x7a6   :  { %v782_v62 = vmul.f32 %v2348_v58, %v781_v61 }
 0x7a8   :  { %v783_v63 = vadd.f32 1.4214138, %v782_v62 }
 0x7aa   :  { %v784_v0 = vmul.f32 %v2348_v58, %v783_v63 }
 0x7ac   :  { %v785_v1 = vadd.f32 -0.28449672, %v784_v0 }
 0x7ae   :  { %v786_v2 = vmul.f32 %v2348_v58, %v785_v1 }
 0x7b0   :  { %v787_v3 = vadd.f32 0.2548296, %v786_v2 }
 0x7b2   :  { %v788_v4 = vmul.f32 %v2348_v58, %v787_v3 }
 0x7b4   :  { %v793_v6 = vmul.f32 %v2350_v5, %v788_v4 }
 0x7b6   :  { %v794_v7 = vsub.f32 1.0, %v793_v6 }
 0x7b8   :  { %v795_v10 = vmul.f32 %v794_v7, %v774_v9 }
 0x7ba   :  { %v796_v11 = vadd.f32 1.0, %v795_v10 }
 0x7bc   :  { %v797_v12 = vmul.f32 %v796_v11, %v771_v26 }
 0x7be   :  { %v798_v13 = vpack.c.bf16 %v797_v12, %v797_v12 }
 0x7c0   :  { %2177 = vmatmul.mubr.bf16.vlgmr.msra.gmra.mxu1 %v798_v13 }
 0x7c1   :  { %2208 = vmatprep.mubr.msk.bf16.mxu1 %vm2428_vm8, %v2427_v27 }
 0x880   :  { %v897_v15 = vpop.f32.mrf.mxu1 }
 0x881   :  { %v2702_v16 = vadd.f32 %v897_v15, %v2659_v36 }
 0x882   :  { %v2178_v18 = vpop.f32.mrf.mxu1 }
 0x883   :  { %v906_v21 = vsel %vm110_vm7, %v2702_v16, 0.0 }
 0x884   :  { %907 = vadd.xlane.f32.xlu1 %v906_v21  ;;  %v900_v22 = vpop.f32.mrf.mxu1 }
 0x886   :  { %v2179_v23 = vpop.f32.mrf.mxu1 }
 0x90d   :  { %v908_v24 = vpop.xlane.xlu1 %907 }
 0x90e   :  { %v909_v28 = vmul.f32 0.03125, %v908_v24 }
 0x910   :  { %v910_v25 = vsub.f32 %v2702_v16, %v909_v28 }
 0x912   :  { %v911_v29 = vmul.f32 %v910_v25, %v910_v25 }
 0x914   :  { %v912_v30 = vsel %vm110_vm7, %v911_v29, 0.0 }
 0x915   :  { %913 = vadd.xlane.f32.xlu0 %v912_v30 }
 0x92b   :  { %925 = vrot.lane.b32.xlu0 %v2720_v32, %s2426_s1 }
 0x99e   :  { %v914_v34 = vpop.xlane.xlu0 %913 }
 0x99f   :  { %v915_v35 = vmul.f32 0.03125, %v914_v34 }
 0x9a1   :  { %v916_v36 = vadd.f32 1e-05, %v915_v35 }
 0x9a2   :  { %v926_v19 = vpop.permute.xlu0 %925 }
 0x9a3   :  { %2351 = vrsqrt.f32 %v916_v36 }
 0x9b0   :  { %v2352_v37 = vpop.eup %2351 }
 0x9b1   :  { %v918_v39 = vmul.f32 %v2352_v37, %v910_v25 }
 0x9b3   :  { %v923_v40 = vmul.f32 %v2720_v32, %v918_v39 }
 0x9b5   :  { %v928_v41 = vadd.f32 %v926_v19, %v923_v40 }
 0x9b7   :  { %v929_v14 = vpack.c.bf16 %v928_v41, %v928_v41 }
 0x9b9   :  { %2185 = vmatmul.mubr.msk.bf16.vlgmr.msra.gmra.mxu0 %vm110_vm7, %v929_v14 }
 0x9ba   :  { %2190 = vmatprep.mubr.msk.bf16.mxu0 %vm2428_vm8, %v2427_v27 }
 0xa79   :  { %v988_v44 = vpop.f32.mrf.mxu0 }
 0xa7a   :  { %v989_v45 = vadd.f32 %v988_v44, %v938_v42 }
 0xa7b   :  { %v2186_v46 = vpop.f32.mrf.mxu0 }
 0xa7c   :  { %v2737_v47 = vpack.c.bf16 %v989_v45, %v989_v45 }
 0xa7d   :  { %v991_v48 = vpop.f32.mrf.mxu0 }
 0xa7e   :  { %996 = vrot.lane.b32.xlu1 %v2737_v47, %s2426_s1 }
 0xa7f   :  { %v2187_v49 = vpop.f32.mrf.mxu0 }
 0xaf0   :  { %v997_v50 = vpop.permute.xlu1 %996 }
 0xaf1   :  { %v1002_v51 = vsel %vm203_vm9, %v997_v50, 0 }
 0xaf2   :  { %2189 = vmatpush3.bf16.xpose.msra.mxu0 %v1002_v51 }
 0xaf3   :  { %2194 = vmatprep.subr.bf16.mxu0 %v2427_v27 }
 0xaf9   :  { %2191 = vmatmul.mubr.msk.bf16.vlgmr.msra.gmra.mxu0 %vm203_vm9, %v2737_v47 }
 0xafa   :  { %2196 = vmatprep.mubr.msk.bf16.mxu0 %vm2428_vm8, %v2427_v27 }
 0xbb9   :  { %v1038_v17 = vpop.f32.mrf.mxu0 }
 0xbba   :  { %v1044_v38 = vsel %vm203_vm9, %v1038_v17, -inf }
 0xbbb   :  { %1045 = vmax.xlane.f32.xlu1 %v1044_v38  ;;  %v2192_v52 = vpop.f32.mrf.mxu0 }
 0xbbd   :  { %v1041_v43 = vpop.f32.mrf.mxu0 }
 0xbbf   :  { %v2193_v53 = vpop.f32.mrf.mxu0 }
 0xbcc   :  { %1106 = vrot.lane.b32.xlu1 %v2737_v47, %s2429_s14 }
 0xbd0   :  { %1104 = vrot.lane.b32.xlu1 %v2737_v47, %s2430_s15 }
 0xbd4   :  { %1214 = vrot.lane.b32.xlu1 %v2737_v47, %s2432_s17 }
 0xbd8   :  { %1324 = vrot.lane.b32.xlu1 %v2737_v47, %s2434_s19 }
 0xc44   :  { %v1046_v54 = vpop.xlane.xlu1 %1045 }
 0xc45   :  { %v1047_v55 = vsub.f32 %v1038_v17, %v1046_v54 }
 0xc47   :  { %v1048_v56 = vmul.f32 1.442695, %v1047_v55 }
 0xc48   :  { %v1107_v0 = vpop.permute.xlu1 %1106 }
 0xc49   :  { %2353 = vpow2.f32 %v1048_v56  ;;  %v1112_v2 = vsel %vm203_vm9, %v1107_v0, 0 }
 0xc4c   :  { %v1105_v4 = vpop.permute.xlu1 %1104 }
 0xc50   :  { %v1215_v7 = vpop.permute.xlu1 %1214 }
 0xc54   :  { %v1325_v10 = vpop.permute.xlu1 %1324 }
 0xc56   :  { %v2354_v57 = vpop.eup %2353 }
 0xc57   :  { %v1050_v58 = vsel %vm203_vm9, %v2354_v57, 0.0 }
 0xc58   :  { %1051 = vadd.xlane.f32.xlu0 %v1050_v58 }
 0xc6e   :  { %1056 = vrot.lane.b32.xlu0 %v2737_v47, %s2436_s21 }
 0xc72   :  { %1216 = vrot.lane.b32.xlu0 %v2737_v47, %s2431_s16 }
 0xc76   :  { %1326 = vrot.lane.b32.xlu0 %v2737_v47, %s2433_s18 }
 0xce1   :  { %v1052_v59 = vpop.xlane.xlu0 %1051 }
 0xce2   :  { %2355 = vrcp.f32 %v1052_v59 }
 0xce5   :  { %v1057_v60 = vpop.permute.xlu0 %1056 }
 0xce6   :  { %v1062_v61 = vsel %vm101_vm3, %v1057_v60, 0 }
 0xce7   :  { %2195 = vmatpush3.bf16.msra.mxu0 %v1062_v61 }
 0xce8   :  { %2200 = vmatprep.subr.bf16.mxu0 %v2427_v27 }
 0xce9   :  { %v1217_v3 = vpop.permute.xlu0 %1216 }
 0xcea   :  { %v1222_v5 = vsel %vm203_vm9, %v1217_v3, 0 }
 0xced   :  { %v1327_v6 = vpop.permute.xlu0 %1326 }
 0xcee   :  { %v1332_v9 = vsel %vm203_vm9, %v1327_v6, 0 }
 0xcef   :  { %v2356_v62 = vpop.eup %2355 }
 0xcf0   :  { %v1054_v63 = vmul.f32 %v2356_v62, %v2354_v57 }
 0xcf2   :  { %v1055_v1 = vpack.c.bf16 %v1054_v63, %v1054_v63 }
 0xcf4   :  { %2197 = vmatmul.mubr.msk.bf16.vlgmr.msra.gmra.mxu0 %vm203_vm9, %v1055_v1 }
 0xcf5   :  { %2201 = vmatpush3.bf16.xpose.msra.mxu0 %v1112_v2  ;;  %2202 = vmatprep.mubr.msk.bf16.mxu0 %vm2428_vm8, %v2427_v27 }
 0xcf6   :  { %2212 = vmatprep.subr.bf16.mxu0 %v2427_v27 }
 0xcfc   :  { %2203 = vmatmul.mubr.msk.bf16.vlgmr.msra.gmra.mxu0 %vm203_vm9, %v1105_v4 }
 0xcfd   :  { %2213 = vmatpush3.bf16.xpose.msra.mxu0 %v1222_v5  ;;  %2214 = vmatprep.mubr.msk.bf16.mxu0 %vm2428_vm8, %v2427_v27 }
 0xcfe   :  { %2224 = vmatprep.subr.bf16.mxu0 %v2427_v27 }
 0xd04   :  { %2215 = vmatmul.mubr.msk.bf16.vlgmr.msra.gmra.mxu0 %vm203_vm9, %v1215_v7 }
 0xd05   :  { %2225 = vmatpush3.bf16.xpose.msra.mxu0 %v1332_v9  ;;  %2226 = vmatprep.mubr.msk.bf16.mxu0 %vm2428_vm8, %v2427_v27 }
 0xd06   :  { %2236 = vmatprep.subr.bf16.mxu0 %v2427_v27 }
 0xd0c   :  { %2227 = vmatmul.mubr.msk.bf16.vlgmr.msra.gmra.mxu0 %vm203_vm9, %v1325_v10 }
 0xd0d   :  { %2240 = vmatprep.mubr.msk.bf16.mxu0 %vm2428_vm8, %v2427_v27 }
 0xdb4   :  { %v2783_v26 = vpop.f32.mrf.mxu0 }
 0xdb6   :  { %v2198_v11 = vpop.f32.mrf.mxu0 }
 0xdb8   :  { %v1101_v12 = vpop.f32.mrf.mxu0 }
 0xdba   :  { %v2199_v13 = vpop.f32.mrf.mxu0 }
 0xdbc   :  { %v1148_v15 = vpop.f32.mrf.mxu0 }
 0xdbd   :  { %v1154_v18 = vsel %vm203_vm9, %v1148_v15, -inf }
 0xdbe   :  { %1155 = vmax.xlane.f32.xlu0 %v1154_v18  ;;  %v2204_v21 = vpop.f32.mrf.mxu0 }
 0xdc0   :  { %v1151_v22 = vpop.f32.mrf.mxu0 }
 0xdc2   :  { %v2205_v23 = vpop.f32.mrf.mxu0 }
 0xdc4   :  { %v1258_v24 = vpop.f32.mrf.mxu0 }
 0xdc5   :  { %v1264_v28 = vsel %vm203_vm9, %v1258_v24, -inf }
 0xdc6   :  { %1265 = vmax.xlane.f32.xlu1 %v1264_v28  ;;  %v2216_v25 = vpop.f32.mrf.mxu0 }
 0xdc8   :  { %v1261_v29 = vpop.f32.mrf.mxu0 }
 0xdca   :  { %v2217_v30 = vpop.f32.mrf.mxu0 }
 0xdcc   :  { %v1368_v20 = vpop.f32.mrf.mxu0 }
 0xdcd   :  { %v1374_v34 = vsel %vm203_vm9, %v1368_v20, -inf }
 0xdce   :  { %1375 = vmax.xlane.f32.xlu0 %v1374_v34  ;;  %v2228_v35 = vpop.f32.mrf.mxu0 }
 0xdd0   :  { %v1371_v36 = vpop.f32.mrf.mxu0 }
 0xdd2   :  { %v2229_v37 = vpop.f32.mrf.mxu0 }
 0xdd7   :  { %1166 = vrot.lane.b32.xlu1 %v2737_v47, %s2435_s20 }
 0xe47   :  { %v1156_v39 = vpop.xlane.xlu0 %1155 }
 0xe48   :  { %v1157_v19 = vsub.f32 %v1148_v15, %v1156_v39 }
 0xe4a   :  { %v1158_v40 = vmul.f32 1.442695, %v1157_v19 }
 0xe4c   :  { %2357 = vpow2.f32 %v1158_v40 }
 0xe4f   :  { %v1266_v41 = vpop.xlane.xlu1 %1265 }
 0xe50   :  { %v1267_v14 = vsub.f32 %v1258_v24, %v1266_v41  ;;  %v2309_v41 = vld [vmem:[%s2909_s4 + $0x78] sm:$0xff]  }
 0xe52   :  { %v1268_v42 = vmul.f32 1.442695, %v1267_v14  ;;  %v2310_v14 = vld [vmem:[%s2909_s4 + $0x70] sm:$0xff]  }
 0xe53   :  { %v1167_v44 = vpop.permute.xlu1 %1166 }
 0xe54   :  { %2359 = vpow2.f32 %v1268_v42  ;;  %v1172_v45 = vsel %vm101_vm3, %v1167_v44, 0  ;;  %v2312_v42 = vld [vmem:[%s2909_s4 + $0x60] sm:$0xff]   ;;  %v2313_v44 = vld [vmem:[%s2909_s4 + $0x58] sm:$0xff]  }
 0xe55   :  { %2207 = vmatpush3.bf16.msra.mxu1 %v1172_v45  ;;  %v2314_v45 = vld [vmem:[%s2909_s4 + $0x50] sm:$0xff]  }
 0xe56   :  { %2218 = vmatprep.subr.bf16.mxu1 %v2427_v27 }
 0xe57   :  { %v1376_v46 = vpop.xlane.xlu0 %1375 }
 0xe58   :  { %v1377_v48 = vsub.f32 %v1368_v20, %v1376_v46  ;;  %v2315_v46 = vld [vmem:[%s2909_s4 + $0x48] sm:$0xff]  }
 0xe59   :  { %v2358_v49 = vpop.eup %2357 }
 0xe5a   :  { %v1378_v50 = vmul.f32 1.442695, %v1377_v48  ;;  %v1160_v51 = vsel %vm203_vm9, %v2358_v49, 0.0  ;;  %v2316_v48 = vld [vmem:[%s2909_s4 + $0x40] sm:$0xff]  }
 0xe5b   :  { %1161 = vadd.xlane.f32.xlu0 %v1160_v51 }
 0xe5c   :  { %2361 = vpow2.f32 %v1378_v50  ;;  %v2319_v50 = vld [vmem:[%s2910_s5 + $0x24] ss:$16 sps:$4 sm:$0xff]  }
 0xe61   :  { %v2360_v17 = vpop.eup %2359 }
 0xe62   :  { %v1270_v38 = vsel %vm203_vm9, %v2360_v17, 0.0 }
 0xe63   :  { %1271 = vadd.xlane.f32.xlu1 %v1270_v38 }
 0xe69   :  { %v2362_v52 = vpop.eup %2361 }
 0xe6a   :  { %v1380_v43 = vsel %vm203_vm9, %v2362_v52, 0.0 }
 0xe6b   :  { %1381 = vadd.xlane.f32.xlu0 %v1380_v43 }
 0xe74   :  { %1386 = vrot.lane.b32.xlu1 %v2737_v47, %s2437_s22 }
 0xe78   :  { %1452 = vrot.lane.b32.xlu1 %v2711_v31, %s2439_s24 }
 0xe81   :  { %1276 = vrot.lane.b32.xlu0 %v2737_v47, %s2438_s23 }
 0xee4   :  { %v1162_v53 = vpop.xlane.xlu0 %1161 }
 0xee5   :  { %2363 = vrcp.f32 %v1162_v53 }
 0xeec   :  { %v1272_v54 = vpop.xlane.xlu1 %1271 }
 0xeed   :  { %2365 = vrcp.f32 %v1272_v54 }
 0xef0   :  { %v1387_v61 = vpop.permute.xlu1 %1386 }
 0xef1   :  { %v1392_v63 = vsel %vm101_vm3, %v1387_v61, 0 }
 0xef2   :  { %v2364_v55 = vpop.eup %2363 }
 0xef3   :  { %v1164_v56 = vmul.f32 %v2364_v55, %v2358_v49  ;;  %v2317_v49 = vld [vmem:[%s2910_s5 + $0x20] ss:$16 sps:$4 sm:$0xff]  }
 0xef4   :  { %v1382_v57 = vpop.xlane.xlu0 %1381  ;;  %v1453_v3 = vpop.permute.xlu1 %1452 }
 0xef5   :  { %2367 = vrcp.f32 %v1382_v57  ;;  %v1165_v58 = vpack.c.bf16 %v1164_v56, %v1164_v56  ;;  %2237 = vmatpush3.bf16.msra.mxu0 %v1453_v3 }
 0xef6   :  { %2238 = vmatprep.subr.bf16.mxu0 %v2427_v27 }
 0xef7   :  { %2209 = vmatmul.mubr.msk.bf16.vlgmr.msra.gmra.mxu1 %vm203_vm9, %v1165_v58 }
 0xef8   :  { %v1277_v59 = vpop.permute.xlu0 %1276  ;;  %2220 = vmatprep.mubr.msk.bf16.mxu1 %vm2428_vm8, %v2427_v27 }
 0xef9   :  { %v1282_v31 = vsel %vm101_vm3, %v1277_v59, 0 }
 0xefa   :  { %v2366_v60 = vpop.eup %2365  ;;  %2219 = vmatpush3.bf16.msra.mxu1 %v1282_v31 }
 0xefb   :  { %2230 = vmatprep.subr.bf16.mxu1 %v2427_v27  ;;  %v1274_v47 = vmul.f32 %v2366_v60, %v2360_v17 }
 0xefd   :  { %v1275_v62 = vpack.c.bf16 %v1274_v47, %v1274_v47 }
 0xeff   :  { %2221 = vmatmul.mubr.msk.bf16.vlgmr.msra.gmra.mxu1 %vm203_vm9, %v1275_v62 }
 0xf00   :  { %2231 = vmatpush3.bf16.msra.mxu1 %v1392_v63  ;;  %2232 = vmatprep.mubr.msk.bf16.mxu1 %vm2428_vm8, %v2427_v27 }
 0xf01   :  { %2244 = vmatprep.subr.bf16.mxu1 %v2427_v27 }
 0xf02   :  { %v2368_v0 = vpop.eup %2367 }
 0xf03   :  { %v1384_v1 = vmul.f32 %v2368_v0, %v2362_v52 }
 0xf05   :  { %v1385_v2 = vpack.c.bf16 %v1384_v1, %v1384_v1 }
 0xf07   :  { %2233 = vmatmul.mubr.msk.bf16.vlgmr.msra.gmra.mxu1 %vm203_vm9, %v1385_v2 }
 0xf08   :  { %2248 = vmatprep.mubr.msk.bf16.mxu1 %vm2428_vm8, %v2427_v27 }
 0xfb7   :  { %v1208_v4 = vpop.f32.mrf.mxu1 }
 0xfb8   :  { %1435 = vrot.lane.b32.xlu0 %v1208_v4, %s2440_s25 }
 0xfb9   :  { %v2210_v5 = vpop.f32.mrf.mxu1 }
 0xfbb   :  { %v1211_v6 = vpop.f32.mrf.mxu1 }
 0xfbd   :  { %v2211_v7 = vpop.f32.mrf.mxu1 }
 0xfbf   :  { %v1318_v9 = vpop.f32.mrf.mxu1 }
 0xfc0   :  { %1439 = vrot.lane.b32.xlu1 %v1318_v9, %s2441_s26 }
 0xfc1   :  { %v2222_v10 = vpop.f32.mrf.mxu1 }
 0xfc3   :  { %v1321_v11 = vpop.f32.mrf.mxu1 }
 0xfc4   :  { %1450 = vrot.lane.b32.xlu1 %v2727_v33, %s2439_s24 }
 0xfc5   :  { %v2223_v12 = vpop.f32.mrf.mxu1 }
 0xfc6   :  { %v2322_v12 = vld [vmem:[%s2910_s5 + $0x4] ss:$16 sps:$4 sm:$0xff]  }
 0xfc7   :  { %v1428_v13 = vpop.f32.mrf.mxu1 }
 0xfc8   :  { %1443 = vrot.lane.b32.xlu0 %v1428_v13, %s2442_s28  ;;  %v2320_v13 = vld [vmem:[%s2910_s5] ss:$16 sps:$4 sm:$0xff]  }
 0xfc9   :  { %v2234_v15 = vpop.f32.mrf.mxu1 }
 0xfca   :  { %v2444_v15 = vmov 0  }
 0xfcb   :  { %v1431_v18 = vpop.f32.mrf.mxu1 }
 0xfcc   :  { %1456 = vrot.lane.b32.xlu0 %v2720_v32, %s2436_s21  ;;  %v2307_v32 = vld [vmem:[%s2908_s3 + $0x34] ss:$8 sps:$4 sm:$0xff]  }
 0xfcd   :  { %v2235_v21 = vpop.f32.mrf.mxu1  ;;  %2245 = vmatpush3.bf16.msra.mxu1 %v2307_v32 }
 0xfce   :  { %2246 = vmatprep.subr.bf16.mxu1 %v2427_v27 }
0x102a   :  { %v1436_v23 = vpop.permute.xlu0 %1435 }
0x102b   :  { %v1446_v28 = vsel %vm203_vm9, %v2783_v26, %v1436_v23  ;;  %v2308_v26 = vld [vmem:[%s2908_s3 + $0x24] ss:$8 sps:$4 sm:$0xff]   ;;  %v2323_v23 = vld [vmem:[%s2910_s5 + $0x28] ss:$16 sps:$4 sm:$0xff]  }
0x102c   :  { %2247 = vmatpush3.bf16.msra.mxu1 %v2308_v26 }
0x102d   :  { %1761 = vmatprep.subr.bf16.mxu1 %v2319_v50 }
0x1032   :  { %v1440_v22 = vpop.permute.xlu1 %1439 }
0x1033   :  { %v1447_v33 = vsel %vm653_vm10, %v1446_v28, %v1440_v22  ;;  %v2328_v28 = vld [vmem:[%s2910_s5 + $0xc] ss:$16 sps:$4 sm:$0xff]  }
0x1036   :  { %v1451_v24 = vpop.permute.xlu1 %1450 }
0x1037   :  { %2239 = vmatpush3.bf16.msra.mxu0 %v1451_v24 }
0x1038   :  { %2252 = vmatprep.subr.bf16.mxu0 %v2427_v27 }
0x103a   :  { %v1444_v25 = vpop.permute.xlu0 %1443 }
0x103b   :  { %v1448_v29 = vsel %vm655_vm11, %v1447_v33, %v1444_v25 }
0x103c   :  { %v1449_v30 = vpack.c.bf16 %v1448_v29, %v1448_v29  ;;  %v2326_v29 = vld [vmem:[%s2910_s5 + $0x8] ss:$16 sps:$4 sm:$0xff]  }
0x103e   :  { %2241 = vmatmul.mubr.msk.bf16.vlgmr.msra.gmra.mxu0 %vm110_vm7, %v1449_v30  ;;  %v1457_v20 = vpop.permute.xlu0 %1456 }
0x103f   :  { %2268 = vmatprep.mubr.msk.bf16.mxu0 %vm2428_vm8, %v2427_v27  ;;  %2253 = vmatpush3.bf16.msra.mxu0 %v2309_v41 }
0x1040   :  { %2254 = vmatprep.subr.bf16.mxu0 %v2427_v27 }
0x1043   :  { %2255 = vmatpush3.bf16.msra.mxu0 %v2310_v14 }
0x1044   :  { %2256 = vmatprep.subr.bf16.mxu0 %v2427_v27 }
0x10fe   :  { %v1496_v34 = vpop.f32.mrf.mxu0 }
0x10ff   :  { %v1497_v35 = vadd.f32 %v1496_v34, %v1457_v20 }
0x1100   :  { %v2242_v36 = vpop.f32.mrf.mxu0 }
0x1101   :  { %v2838_v37 = vadd.f32 %v1497_v35, %v2702_v16  ;;  %v2311_v16 = vld [vmem:[%s2909_s4 + $0x68] sm:$0xff]  }
0x1102   :  { %v1499_v39 = vpop.f32.mrf.mxu0  ;;  %2257 = vmatpush3.bf16.msra.mxu0 %v2311_v16 }
0x1103   :  { %v1503_v19 = vpack.c.bf16 %v2838_v37, %v2838_v37  ;;  %2258 = vmatprep.subr.bf16.mxu0 %v2427_v27 }
0x1104   :  { %v2243_v40 = vpop.f32.mrf.mxu0 }
0x1105   :  { %2249 = vmatmul.mubr.msk.bf16.vlgmr.msra.gmra.mxu1 %vm110_vm7, %v1503_v19 }
0x1106   :  { %2259 = vmatpush3.bf16.msra.mxu0 %v2312_v42  ;;  %1762 = vmatpush1.bf16.msra.mxu1 %v2317_v49 }
0x1107   :  { %2260 = vmatprep.subr.bf16.mxu0 %v2427_v27  ;;  %1763 = vmatprep.subr.bf16.mxu1 %v2322_v12 }
0x1108   :  { %1781 = vmatprep.mubr.bf16.mxu1 %v2444_v15 }
0x110a   :  { %2261 = vmatpush3.bf16.msra.mxu0 %v2313_v44  ;;  %1764 = vmatpush1.bf16.msra.mxu1 %v2320_v13 }
0x110b   :  { %2262 = vmatprep.subr.bf16.mxu0 %v2427_v27 }
0x110e   :  { %2263 = vmatpush3.bf16.msra.mxu0 %v2314_v45 }
0x110f   :  { %2264 = vmatprep.subr.bf16.mxu0 %v2427_v27 }
0x1112   :  { %2265 = vmatpush3.bf16.msra.mxu0 %v2315_v46 }
0x1113   :  { %2266 = vmatprep.subr.bf16.mxu0 %v2427_v27 }
0x1116   :  { %2267 = vmatpush3.bf16.msra.mxu0 %v2316_v48 }
0x11c5   :  { %v1557_v51 = vpop.f32.mrf.mxu1 }
0x11c6   :  { %v1564_v17 = vmul.f32 0.70710677, %v1557_v51  ;;  %v1563_v7 = vmul.f32 0.5, %v1557_v51 }
0x11c7   :  { %v2250_v38 = vpop.f32.mrf.mxu1 }
0x11c8   :  { %v1567_v52 = vand.u32 2147483647, %v1564_v17  ;;  %vm1565_vm13 = vcmp.ge.f32.partialorder %v1564_v17, 0.0 }
0x11c9   :  { %v1560_v27 = vpop.f32.mrf.mxu1  ;;  %v1566_v5 = vsel %vm1565_vm13, 1.0, %v2443_v8  ;;  %v2325_v8 = vld [vmem:[%s2910_s5 + $0x2c] ss:$16 sps:$4 sm:$0xff]   ;;  %s2445_s5 = smov [#allocation4]  }
0x11ca   :  { %v1568_v43 = vmul.f32 0.3275911, %v1567_v52  ;;  %v1581_v55 = vsub.f32 0.0, %v1567_v52  ;;  %1802 = vmatprep.subr.bf16.mxu1 %v2325_v8  ;;  %s1909_s18 = sshll.u32 %s2445_s5, 4  ;;  %s1910_s18 = int_to_ptr.vmem [resolvable:$true] %s1909_s18 }
0x11cb   :  { %v2251_v53 = vpop.f32.mrf.mxu1  ;;  %s2401_s19 = scalar_lea.vmem %s1910_s18, 512  ;;  %p2406_p6 = scmp.lt.s32.totalorder %s1910_s18, %s1910_s18 }
0x11cc   :  { %v1569_v54 = vadd.f32 1.0, %v1568_v43  ;;  %v1582_v56 = vmul.f32 %v1581_v55, %v1567_v52  ;;  %p2402_p5 = scmp.ne.s32.totalorder %s1910_s18, %s2401_s19  ;;  %p2407_p7 = scmp.lt.s32.totalorder %s2401_s19, %s2401_s19 }
0x11ce   :  { %2369 = vrcp.f32 %v1569_v54  ;;  %v1583_v59 = vmul.f32 1.442695, %v1582_v56  ;;  %p2408_p8 = por %p2407_p7, %p2406_p6 }
0x11d0   :  { %2371 = vpow2.f32 %v1583_v59  ;;  %p2409_p9 = pnand %p2408_p8, %p2402_p5 }
0x11db   :  { %v2370_v57 = vpop.eup %2369 }
0x11dc   :  { %v1572_v58 = vmul.f32 1.0614054, %v2370_v57 }
0x11dd   :  { %v2372_v2 = vpop.eup %2371 }
0x11de   :  { %v1573_v31 = vadd.f32 -1.4531521, %v1572_v58 }
0x11e0   :  { %v1574_v60 = vmul.f32 %v2370_v57, %v1573_v31 }
0x11e2   :  { %v1575_v47 = vadd.f32 1.4214138, %v1574_v60 }
0x11e4   :  { %v1576_v61 = vmul.f32 %v2370_v57, %v1575_v47 }
0x11e6   :  { %v1577_v62 = vadd.f32 -0.28449672, %v1576_v61 }
0x11e8   :  { %v1578_v63 = vmul.f32 %v2370_v57, %v1577_v62 }
0x11ea   :  { %v1579_v0 = vadd.f32 0.2548296, %v1578_v63 }
0x11ec   :  { %v1580_v1 = vmul.f32 %v2370_v57, %v1579_v0 }
0x11ee   :  { %v1585_v3 = vmul.f32 %v2372_v2, %v1580_v1 }
0x11f0   :  { %v1586_v4 = vsub.f32 1.0, %v1585_v3 }
0x11f2   :  { %v1587_v6 = vmul.f32 %v1586_v4, %v1566_v5 }
0x11f4   :  { %v1588_v9 = vadd.f32 1.0, %v1587_v6 }
0x11f6   :  { %v1589_v10 = vmul.f32 %v1588_v9, %v1563_v7 }
0x11f8   :  { %v1590_v11 = vpack.c.bf16 %v1589_v10, %v1589_v10 }
0x11fa   :  { %2269 = vmatmul.mubr.bf16.vlgmr.msra.gmra.mxu0 %v1590_v11 }
0x12ba   :  { %v1690_v18 = vpop.f32.mrf.mxu0 }
0x12bb   :  { %v1696_v21 = vadd.f32 %v1690_v18, %v2838_v37 }
0x12bc   :  { %v2270_v22 = vpop.f32.mrf.mxu0 }
0x12bd   :  { %v1697_v24 = vpack.c.bf16 %v1696_v21, %v1696_v21 }
0x12be   :  { %v1693_v33 = vpop.f32.mrf.mxu0 }
0x12bf   :  { %2018 = vmatmul.mubr.msk.bf16.vlgmr.msra.gmra.mxu1 %vm110_vm7, %v1697_v24 }
0x12c0   :  { %v2271_v25 = vpop.f32.mrf.mxu0  ;;  %1803 = vmatpush1.bf16.msra.mxu1 %v2323_v23  ;;  %1822 = vmatprep.mubr.bf16.mxu1 %v2444_v15 }
0x12c1   :  { %1804 = vmatprep.subr.bf16.mxu1 %v2328_v28 }
0x12c4   :  { %1805 = vmatpush1.bf16.msra.mxu1 %v2326_v29 }
0x12c7   :  { %2019 = vmatmul.mubr.msk.bf16.vlgmr.msra.gmra.mxu1 %vm110_vm7, %v1697_v24 }
0x137f   :  { %v1783_v30 = vpop.f32.mrf.mxu1 }
0x1380   :  { %v1831_v32 = vrot.slane %v1783_v30, 4 }
0x1381   :  { %v1785_v26 = vpop.f32.mrf.mxu1 }
0x1382   :  { %v1832_v20 = vmax.f32 %v1783_v30, %v1831_v32  ;;  %v1837_v34 = vrot.slane %v1785_v26, 4 }
0x1383   :  { %v1787_v35 = vpop.f32.mrf.mxu1 }
0x1384   :  { %v1833_v36 = vrot.slane %v1832_v20, 2  ;;  %v1838_v37 = vmax.f32 %v1785_v26, %v1837_v34 }
0x1385   :  { %v1788_v39 = vpop.f32.mrf.mxu1 }
0x1386   :  { %v1834_v19 = vmax.f32 %v1832_v20, %v1833_v36  ;;  %v1839_v40 = vrot.slane %v1838_v37, 2 }
0x1387   :  { %v1824_v41 = vpop.f32.mrf.mxu1 }
0x1388   :  { %v1835_v14 = vrot.slane %v1834_v19, 1  ;;  %v1840_v16 = vmax.f32 %v1838_v37, %v1839_v40  ;;  %v1843_v42 = vrot.slane %v1824_v41, 4 }
0x1389   :  { %v1826_v44 = vpop.f32.mrf.mxu1 }
0x138a   :  { %v1836_v45 = vmax.f32 %v1834_v19, %v1835_v14  ;;  %v1841_v46 = vrot.slane %v1840_v16, 1  ;;  %v1844_v48 = vmax.f32 %v1824_v41, %v1843_v42  ;;  %v1849_v49 = vrot.slane %v1826_v44, 4 }
0x138b   :  { %v1828_v50 = vpop.f32.mrf.mxu1 }
0x138c   :  { %v1855_v51 = vsub.f32 %v1783_v30, %v1836_v45  ;;  %v1842_v17 = vmax.f32 %v1840_v16, %v1841_v46  ;;  %v1845_v38 = vrot.slane %v1844_v48, 2  ;;  %v1850_v52 = vmax.f32 %v1826_v44, %v1849_v49 }
0x138d   :  { %v1829_v27 = vpop.f32.mrf.mxu1 }
0x138e   :  { %v1859_v43 = vmul.f32 1.442695, %v1855_v51  ;;  %v1856_v53 = vsub.f32 %v1785_v26, %v1842_v17  ;;  %v1846_v54 = vmax.f32 %v1844_v48, %v1845_v38  ;;  %v1851_v55 = vrot.slane %v1850_v52, 2 }
0x1390   :  { %2373 = vpow2.f32 %v1859_v43  ;;  %v1861_v56 = vmul.f32 1.442695, %v1856_v53  ;;  %v1847_v57 = vrot.slane %v1846_v54, 1  ;;  %v1852_v58 = vmax.f32 %v1850_v52, %v1851_v55 }
0x1392   :  { %2375 = vpow2.f32 %v1861_v56  ;;  %v1848_v59 = vmax.f32 %v1846_v54, %v1847_v57  ;;  %v1853_v31 = vrot.slane %v1852_v58, 1 }
0x1394   :  { %v1857_v60 = vsub.f32 %v1824_v41, %v1848_v59  ;;  %v1854_v47 = vmax.f32 %v1852_v58, %v1853_v31 }
0x1396   :  { %v1863_v61 = vmul.f32 1.442695, %v1857_v60  ;;  %v1858_v62 = vsub.f32 %v1826_v44, %v1854_v47 }
0x1398   :  { %2377 = vpow2.f32 %v1863_v61  ;;  %v1865_v63 = vmul.f32 1.442695, %v1858_v62 }
0x139a   :  { %2379 = vpow2.f32 %v1865_v63 }
0x139d   :  { %v2374_v0 = vpop.eup %2373 }
0x139e   :  { %v1867_v1 = vrot.slane %v2374_v0, 4 }
0x139f   :  { %v2376_v2 = vpop.eup %2375 }
0x13a0   :  { %v1868_v3 = vadd.f32 %v2374_v0, %v1867_v1  ;;  %v1873_v4 = vrot.slane %v2376_v2, 4 }
0x13a2   :  { %v1869_v5 = vrot.slane %v1868_v3, 2  ;;  %v1874_v6 = vadd.f32 %v2376_v2, %v1873_v4 }
0x13a4   :  { %v1870_v7 = vadd.f32 %v1869_v5, %v1868_v3  ;;  %v1875_v9 = vrot.slane %v1874_v6, 2 }
0x13a5   :  { %v2378_v10 = vpop.eup %2377 }
0x13a6   :  { %v1871_v11 = vrot.slane %v1870_v7, 1  ;;  %v1876_v12 = vadd.f32 %v1875_v9, %v1874_v6  ;;  %v1879_v13 = vrot.slane %v2378_v10, 4 }
0x13a7   :  { %v2380_v8 = vpop.eup %2379 }
0x13a8   :  { %v1872_v15 = vadd.f32 %v1871_v11, %v1870_v7  ;;  %v1877_v18 = vrot.slane %v1876_v12, 1  ;;  %v1880_v21 = vadd.f32 %v2378_v10, %v1879_v13  ;;  %v1885_v22 = vrot.slane %v2380_v8, 4 }
0x13aa   :  { %v1878_v23 = vadd.f32 %v1877_v18, %v1876_v12  ;;  %v1881_v24 = vrot.slane %v1880_v21, 2  ;;  %v1886_v28 = vadd.f32 %v2380_v8, %v1885_v22  ;;  %2381 = vrcp.f32 %v1872_v15 }
0x13ac   :  { %v1882_v33 = vadd.f32 %v1881_v24, %v1880_v21  ;;  %v1887_v25 = vrot.slane %v1886_v28, 2  ;;  %2383 = vrcp.f32 %v1878_v23 }
0x13ae   :  { %v1883_v29 = vrot.slane %v1882_v33, 1  ;;  %v1888_v30 = vadd.f32 %v1887_v25, %v1886_v28 }
0x13b0   :  { %v1884_v32 = vadd.f32 %v1883_v29, %v1882_v33  ;;  %v1889_v26 = vrot.slane %v1888_v30, 1 }
0x13b2   :  { %v1890_v20 = vadd.f32 %v1889_v26, %v1888_v30  ;;  %2385 = vrcp.f32 %v1884_v32 }
0x13b4   :  { %2387 = vrcp.f32 %v1890_v20 }
0x13b7   :  { %v2382_v34 = vpop.eup %2381 }
0x13b8   :  { %v1895_v35 = vmul.f32 %v2382_v34, %v2374_v0 }
0x13b9   :  { %v2384_v36 = vpop.eup %2383 }
0x13ba   :  { %v1896_v37 = vmul.f32 %v2384_v36, %v2376_v2  ;;  %1899 = vst [vmem:[#allocation4] sm:$0xff] %v1895_v35 }
0x13bc   :  { %1900 = vst [vmem:[#allocation4 + $0x8] sm:$0xff] %v1896_v37 }
0x13bf   :  { %v2386_v39 = vpop.eup %2385 }
0x13c0   :  { %v1897_v19 = vmul.f32 %v2386_v39, %v2378_v10 }
0x13c1   :  { %v2388_v40 = vpop.eup %2387 }
0x13c2   :  { %v1898_v41 = vmul.f32 %v2388_v40, %v2380_v8  ;;  %1901 = vst [vmem:[#allocation4 + $0x10] sm:$0xff] %v1897_v19 }
0x13c4   :  { %1902 = vst [vmem:[#allocation4 + $0x18] sm:$0xff] %v1898_v41 }
0x13c5   :  { %2412 = shalt.err (!%p2409_p9)
}
0x13c6   :  { %1912 = dma.vmem_to_hbm [thread:$0]  %s1910_s18, 512, %s2911_s6, [#allocation5]  }
0x13c7   :  { %2423 = dma.done.wait [#allocation5], 512  }
0x13c8   :  { %2424 = vsyncadd [#allocation5], 4294966784 }
0x13c9   :  { %1916 = vsyncpa [#allocation5], 1 }

</bundles_post_ra>
